<compile_context>
chip_gen: v7x
topology: tpu7x:2x2x1
jax: 0.10.0
libtpu: 0.0.40
codegen_flags: <defaults>
</compile_context>

<pallas_src>
import math

import jax
import jax.numpy as jnp
from jax.experimental import pallas as pl
from jax.experimental.pallas import tpu as pltpu

B = 2            # batch
S = 8            # sequence length
H = 32           # config.hidden_size
FFN = 64         # encoder feed-forward dim
VOCAB = 64       # synthetic vocab size
CLS_HIDDEN = 16  # args.classifier_hidden
NUM_LABELS = 2
INIT_RANGE = 0.02  # config.initializer_range

NPASS = 3            # three encoder passes (ids, ids_2, ids_3)
NB = NPASS * B       # stacked "batch" of sequences
ROWS = NB * S        # flattened token rows


def _layernorm(x, g, b, eps=1e-12):
    mu = jnp.mean(x, axis=-1, keepdims=True)
    var = jnp.mean((x - mu) ** 2, axis=-1, keepdims=True)
    return (x - mu) * jax.lax.rsqrt(var + eps) * g + b


# ---------------------------------------------------------------------------
# Single fused kernel: encoder (attention + FFN + layernorms + pooler) for all
# 3*B sequences, masked means, SPV/MIP/BWM linears, classifier, log-softmax.
# ---------------------------------------------------------------------------
def fused_forward_kernel(x_ref,        # (ROWS, H)   f32 embedded + LN'd tokens
                         bias_ref,     # (NB, 1, S)  f32 additive attention mask
                         mmask_ref,    # (NB, 1, S)  f32 target mask already * (1/S)
                         wqkvo_ref,    # (H, 4H)     bf16 [Wq/sqrt(H) | Wk | Wv | Wo]
                         lnb_ref,      # (8, H)      f32 [ln1g,ln1b,ln2g,ln2b,b2,bp,0,0]
                         w1_ref,       # (H, FFN)    bf16
                         b1_ref,       # (1, FFN)    f32
                         w2_ref,       # (FFN, H)    bf16
                         wp_ref,       # (H, H)      bf16 pooler weight
                         head_w_ref,   # (4H, 3C)    f32 zero-packed SPV/MIP/BWM weight
                         head_b_ref,   # (1, 3C)     f32
                         cls_w_ref,    # (3C, NUM_LABELS) f32
                         cls_b_ref,    # (1, NUM_LABELS)  f32
                         out_ref):     # (B, NUM_LABELS)  f32 log-softmax logits
    x = x_ref[...]                                            # (ROWS, H) f32
    xb = x.astype(jnp.bfloat16)

    # ---- fused QKV(+O) projection: one lane-dense (32,128) matmul --------------
    wqkvo = wqkvo_ref[...]                                    # (H, 4H) bf16
    qkvx = jnp.dot(xb, wqkvo, preferred_element_type=jnp.float32)    # (ROWS, 4H)
    qkv3 = qkvx.reshape(NB, S, 4 * H)
    q = qkv3[:, :, 0:H].astype(jnp.bfloat16)                  # Wq pre-scaled by 1/sqrt(H)
    k = qkv3[:, :, H:2 * H].astype(jnp.bfloat16)
    v = qkv3[:, :, 2 * H:3 * H].astype(jnp.bfloat16)

    # ---- attention (batched over the NB stacked sequences) ---------------------
    scores = jnp.einsum('bqd,bkd->bqk', q, k,
                        preferred_element_type=jnp.float32)   # (NB, S, S)
    scores = scores + bias_ref[...]                           # additive (1-m)*-1e9
    probs = jax.nn.softmax(scores, axis=-1)                   # f32
    attn = jnp.einsum('bqk,bkd->bqd', probs.astype(jnp.bfloat16), v,
                      preferred_element_type=jnp.float32)     # (NB, S, H)
    attn2 = attn.reshape(ROWS, H)

    wo = wqkvo[:, 3 * H:4 * H]                                # (H, H) bf16
    attn_o = jnp.dot(attn2.astype(jnp.bfloat16), wo,
                     preferred_element_type=jnp.float32)      # (ROWS, H)

    lnb = lnb_ref[...]
    ln1g, ln1b = lnb[0:1, :], lnb[1:2, :]
    ln2g, ln2b = lnb[2:3, :], lnb[3:4, :]
    b2, bp = lnb[4:5, :], lnb[5:6, :]

    h = _layernorm(x + attn_o, ln1g, ln1b)                    # (ROWS, H) f32

    # ---- feed-forward -----------------------------------------------------------
    ffn = jnp.dot(h.astype(jnp.bfloat16), w1_ref[...],
                  preferred_element_type=jnp.float32) + b1_ref[...]
    ffn = jax.nn.gelu(ffn)
    ffn = jnp.dot(ffn.astype(jnp.bfloat16), w2_ref[...],
                  preferred_element_type=jnp.float32) + b2
    seq = _layernorm(h + ffn, ln2g, ln2b)                     # (ROWS, H) sequence output
    seq3 = seq.reshape(NB, S, H)

    # ---- masked means: (seq * target_mask).mean(1); 1/S folded into mmask -------
    tgt3 = jnp.einsum('bqs,bsh->bqh', mmask_ref[...], seq3,
                      preferred_element_type=jnp.float32)     # (NB, 1, H)
    tgt = tgt3[:, 0, :]                                       # (NB, H)

    # ---- tanh pooler on CLS token ------------------------------------------------
    cls_tok = seq3[:, 0, :]                                   # (NB, H)
    pooled = jnp.tanh(jnp.dot(cls_tok.astype(jnp.bfloat16), wp_ref[...],
                              preferred_element_type=jnp.float32) + bp)

    # ---- head: SPV / MIP / BWM + classifier + log-softmax ------------------------
    p1 = pooled[0:B, :]            # pass 0: pooled_output
    t1 = tgt[0:B, :]               # pass 0: target_output
    t2 = tgt[B:2 * B, :]           # pass 1: target_output_2
    p3 = pooled[2 * B:3 * B, :]    # pass 2: pooled_output_3

    hw = head_w_ref[...]           # (4H, 3C), row blocks = [p1, t1, t2, p3]
    hidden = (jnp.dot(p1, hw[0:H, :], preferred_element_type=jnp.float32)
              + jnp.dot(t1, hw[H:2 * H, :], preferred_element_type=jnp.float32)
              + jnp.dot(t2, hw[2 * H:3 * H, :], preferred_element_type=jnp.float32)
              + jnp.dot(p3, hw[3 * H:4 * H, :], preferred_element_type=jnp.float32)
              + head_b_ref[...])                              # (B, 3C) = [SPV|MIP|BWM]

    logits = jnp.dot(hidden, cls_w_ref[...],
                     preferred_element_type=jnp.float32) + cls_b_ref[...]
    out_ref[...] = jax.nn.log_softmax(logits, axis=1)         # nn.LogSoftmax(dim=1)


def _full_spec(shape):
    zeros = (0,) * len(shape)
    return pl.BlockSpec(shape, lambda i, _z=zeros: _z)


# ---------------------------------------------------------------------------
# Full forward pass (labels=None branch → returns log-softmax logits).
# Dropout(args.dropout_rate) is identity at inference time.
# TODO(synk): training-mode dropout and the NLLLoss (labels is not None) branch
#             are not modeled in-kernel.
# ---------------------------------------------------------------------------
@jax.jit
def forward(pp, input_ids, input_ids_2, target_mask, target_mask_2,
            attention_mask_2, input_ids_3, attention_mask_3,
            token_type_ids, attention_mask):
    # --- host-side glue: embeddings + embedding layernorm for the 3 stacked passes
    ids = jnp.concatenate([input_ids, input_ids_2, input_ids_3], axis=0)     # (NB, S)
    tt = jnp.concatenate([token_type_ids,
                          jnp.zeros_like(input_ids_2),
                          jnp.zeros_like(input_ids_3)], axis=0)
    am = jnp.concatenate([attention_mask, attention_mask_2, attention_mask_3],
                         axis=0).astype(jnp.float32)                          # (NB, S)
    mm = jnp.concatenate([target_mask, target_mask_2,
                          jnp.zeros_like(target_mask)], axis=0).astype(jnp.float32)

    emb = (jnp.take(pp["tok_emb"], ids, axis=0)
           + pp["pos_emb"][None, :, :]
           + jnp.take(pp["type_emb"], tt, axis=0))
    emb = _layernorm(emb, pp["emb_ln_g"], pp["emb_ln_b"]).astype(jnp.float32)
    x = emb.reshape(ROWS, H)

    att_bias = ((1.0 - am) * (-1e9)).reshape(NB, 1, S)        # additive mask, kept f32
    mmask = (mm * (1.0 / S)).reshape(NB, 1, S)                # .mean(1) scale folded in

    C = CLS_HIDDEN
    return pl.pallas_call(
        fused_forward_kernel,
        grid=(1,),
        in_specs=[
            _full_spec((ROWS, H)),             # x
            _full_spec((NB, 1, S)),            # attention bias
            _full_spec((NB, 1, S)),            # mean mask
            _full_spec((H, 4 * H)),            # packed Wq|Wk|Wv|Wo
            _full_spec((8, H)),                # stacked LN params + biases
            _full_spec((H, FFN)),              # w1
            _full_spec((1, FFN)),              # b1
            _full_spec((FFN, H)),              # w2
            _full_spec((H, H)),                # pooler weight
            _full_spec((4 * H, 3 * C)),        # packed head weight
            _full_spec((1, 3 * C)),            # packed head bias
            _full_spec((3 * C, NUM_LABELS)),   # classifier weight
            _full_spec((1, NUM_LABELS)),       # classifier bias
        ],
        out_specs=_full_spec((B, NUM_LABELS)),
        out_shape=jax.ShapeDtypeStruct((B, NUM_LABELS), jnp.float32),
    )(x, att_bias, mmask,
      pp["wqkvo"], pp["lnb"], pp["w1"], pp["b1"], pp["w2"], pp["wp"],
      pp["head_w"], pp["head_b"], pp["cls_w"], pp["cls_b"])


def init_params(key):
    ks = jax.random.split(key, 14)

    def n(k, shape):
        # matches module._init_weights: normal(mean=0, std=initializer_range), zero bias
        return (INIT_RANGE * jax.random.normal(k, shape)).astype(jnp.float32)

    return {
        # synthetic encoder
        "tok_emb": n(ks[0], (VOCAB, H)),
        "pos_emb": n(ks[1], (S, H)),
        "type_emb": n(ks[2], (2, H)),
        "emb_ln_g": jnp.ones((1, H), jnp.float32),
        "emb_ln_b": jnp.zeros((1, H), jnp.float32),
        "wq": n(ks[3], (H, H)), "wk": n(ks[4], (H, H)),
        "wv": n(ks[5], (H, H)), "wo": n(ks[6], (H, H)),
        "ln1_g": jnp.ones((1, H), jnp.float32), "ln1_b": jnp.zeros((1, H), jnp.float32),
        "w1": n(ks[7], (H, FFN)), "b1": jnp.zeros((1, FFN), jnp.float32),
        "w2": n(ks[8], (FFN, H)), "b2": jnp.zeros((1, H), jnp.float32),
        "ln2_g": jnp.ones((1, H), jnp.float32), "ln2_b": jnp.zeros((1, H), jnp.float32),
        "wp": n(ks[9], (H, H)), "bp": jnp.zeros((1, H), jnp.float32),
        # classification heads (stored as (in, out) == transpose of torch Linear.weight)
        "spv_w": n(ks[10], (2 * H, CLS_HIDDEN)),
        "spv_b": jnp.zeros((1, CLS_HIDDEN), jnp.float32),
        "mip_w": n(ks[11], (2 * H, CLS_HIDDEN)),
        "mip_b": jnp.zeros((1, CLS_HIDDEN), jnp.float32),
        "bwm_w": n(ks[12], (2 * H, CLS_HIDDEN)),
        "bwm_b": jnp.zeros((1, CLS_HIDDEN), jnp.float32),
        "cls_w": n(ks[13], (3 * CLS_HIDDEN, NUM_LABELS)),
        "cls_b": jnp.zeros((1, NUM_LABELS), jnp.float32),
    }


def pack_params(p):
    """Pack weights once on the host: fewer / lane-dense kernel operands."""
    C = CLS_HIDDEN
    scale = 1.0 / math.sqrt(H)
    wqkvo = jnp.concatenate([p["wq"] * scale, p["wk"], p["wv"], p["wo"]],
                            axis=1).astype(jnp.bfloat16)                     # (H, 4H)
    lnb = jnp.concatenate([p["ln1_g"], p["ln1_b"], p["ln2_g"], p["ln2_b"],
                           p["b2"], p["bp"],
                           jnp.zeros((2, H), jnp.float32)], axis=0)          # (8, H)
    z = jnp.zeros((H, C), jnp.float32)
    # rows: [pooled1 | tgt1 | tgt2 | pooled3], cols: [SPV | MIP | BWM]
    head_w = jnp.concatenate([
        jnp.concatenate([p["spv_w"][0:H], z, p["bwm_w"][0:H]], axis=1),
        jnp.concatenate([p["spv_w"][H:2 * H], p["mip_w"][H:2 * H], z], axis=1),
        jnp.concatenate([z, p["mip_w"][0:H], z], axis=1),
        jnp.concatenate([z, z, p["bwm_w"][H:2 * H]], axis=1),
    ], axis=0)                                                               # (4H, 3C)
    head_b = jnp.concatenate([p["spv_b"], p["mip_b"], p["bwm_b"]], axis=1)   # (1, 3C)
    return {
        "tok_emb": p["tok_emb"], "pos_emb": p["pos_emb"], "type_emb": p["type_emb"],
        "emb_ln_g": p["emb_ln_g"], "emb_ln_b": p["emb_ln_b"],
        "wqkvo": wqkvo, "lnb": lnb,
        "w1": p["w1"].astype(jnp.bfloat16), "b1": p["b1"],
        "w2": p["w2"].astype(jnp.bfloat16),
        "wp": p["wp"].astype(jnp.bfloat16),
        "head_w": head_w, "head_b": head_b,
        "cls_w": p["cls_w"], "cls_b": p["cls_b"],
    }


if __name__ == "__main__":
    key = jax.random.PRNGKey(0)
    pkey, dkey = jax.random.split(key)
    params = pack_params(init_params(pkey))

    dks = jax.random.split(dkey, 3)
    input_ids = jax.random.randint(dks[0], (B, S), 0, VOCAB, dtype=jnp.int32)
    input_ids_2 = jax.random.randint(dks[1], (B, S), 0, VOCAB, dtype=jnp.int32)
    input_ids_3 = jax.random.randint(dks[2], (B, S), 0, VOCAB, dtype=jnp.int32)
    target_mask = jnp.zeros((B, S), jnp.int32).at[:, 2].set(1)
    target_mask_2 = jnp.zeros((B, S), jnp.int32).at[:, 3].set(1)
    attention_mask = jnp.ones((B, S), jnp.int32)
    attention_mask_2 = jnp.ones((B, S), jnp.int32)
    attention_mask_3 = jnp.ones((B, S), jnp.int32)
    token_type_ids = jnp.zeros((B, S), jnp.int32)

    logits = forward(params, input_ids, input_ids_2, target_mask, target_mask_2,
                     attention_mask_2, input_ids_3, attention_mask_3,
                     token_type_ids, attention_mask)
    jax.block_until_ready(logits)
    assert logits.shape == (B, NUM_LABELS), logits.shape
    print("KERNEL_OK")
</pallas_src>

<mosaic_0001>
module attributes {stable_mosaic.version = 11 : i64} {
  func.func @fused_forward_kernel(%arg0: i32, %arg1: memref<48x32xf32, #tpu.memory_space<vmem>>, %arg2: memref<6x1x8xf32, #tpu.memory_space<vmem>>, %arg3: memref<6x1x8xf32, #tpu.memory_space<vmem>>, %arg4: memref<32x128xbf16, #tpu.memory_space<vmem>>, %arg5: memref<8x32xf32, #tpu.memory_space<vmem>>, %arg6: memref<32x64xbf16, #tpu.memory_space<vmem>>, %arg7: memref<1x64xf32, #tpu.memory_space<vmem>>, %arg8: memref<64x32xbf16, #tpu.memory_space<vmem>>, %arg9: memref<32x32xbf16, #tpu.memory_space<vmem>>, %arg10: memref<128x48xf32, #tpu.memory_space<vmem>>, %arg11: memref<1x48xf32, #tpu.memory_space<vmem>>, %arg12: memref<48x2xf32, #tpu.memory_space<vmem>>, %arg13: memref<1x2xf32, #tpu.memory_space<vmem>>, %arg14: memref<2x2xf32, #tpu.memory_space<vmem>>) attributes {dimension_semantics = [#tpu.dimension_semantics<arbitrary>], iteration_bounds = array<i64: 1>, scalar_prefetch = 0 : i64, scratch_operands = 0 : i64, tpu.core_type = #tpu.core_type<tc>, window_params = [{pipeline_mode = #tpu.pipeline_mode<synchronous>, transform_indices = @transform_0, window_bounds = array<i64: 48, 32>}, {pipeline_mode = #tpu.pipeline_mode<synchronous>, transform_indices = @transform_1, window_bounds = array<i64: 6, 1, 8>}, {pipeline_mode = #tpu.pipeline_mode<synchronous>, transform_indices = @transform_2, window_bounds = array<i64: 6, 1, 8>}, {pipeline_mode = #tpu.pipeline_mode<synchronous>, transform_indices = @transform_3, window_bounds = array<i64: 32, 128>}, {pipeline_mode = #tpu.pipeline_mode<synchronous>, transform_indices = @transform_4, window_bounds = array<i64: 8, 32>}, {pipeline_mode = #tpu.pipeline_mode<synchronous>, transform_indices = @transform_5, window_bounds = array<i64: 32, 64>}, {pipeline_mode = #tpu.pipeline_mode<synchronous>, transform_indices = @transform_6, window_bounds = array<i64: 1, 64>}, {pipeline_mode = #tpu.pipeline_mode<synchronous>, transform_indices = @transform_7, window_bounds = array<i64: 64, 32>}, {pipeline_mode = #tpu.pipeline_mode<synchronous>, transform_indices = @transform_8, window_bounds = array<i64: 32, 32>}, {pipeline_mode = #tpu.pipeline_mode<synchronous>, transform_indices = @transform_9, window_bounds = array<i64: 128, 48>}, {pipeline_mode = #tpu.pipeline_mode<synchronous>, transform_indices = @transform_10, window_bounds = array<i64: 1, 48>}, {pipeline_mode = #tpu.pipeline_mode<synchronous>, transform_indices = @transform_11, window_bounds = array<i64: 48, 2>}, {pipeline_mode = #tpu.pipeline_mode<synchronous>, transform_indices = @transform_12, window_bounds = array<i64: 1, 2>}, {pipeline_mode = #tpu.pipeline_mode<synchronous>, transform_indices = @transform_13, window_bounds = array<i64: 2, 2>}]} {
    %c0 = arith.constant 0 : index
    %c0_0 = arith.constant 0 : index
    %0 = vector.load %arg1[%c0, %c0_0] : memref<48x32xf32, #tpu.memory_space<vmem>>, vector<48x32xf32>
    %1 = arith.truncf %0 : vector<48x32xf32> to vector<48x32xbf16>
    %c0_1 = arith.constant 0 : index
    %c0_2 = arith.constant 0 : index
    %2 = vector.load %arg4[%c0_1, %c0_2] : memref<32x128xbf16, #tpu.memory_space<vmem>>, vector<32x128xbf16>
    %cst = arith.constant dense<0.000000e+00> : vector<48x128xf32>
    %3 = tpu.matmul %1, %2, %cst {dimension_numbers = #tpu.dot_dimension_numbers<[1], [0], [0], [1], [0, 0, 1, 1], [], []>} : vector<48x32xbf16>, vector<32x128xbf16>, vector<48x128xf32> -> vector<48x128xf32>
    %4 = vector.shape_cast %3 : vector<48x128xf32> to vector<6x8x128xf32>
    %5 = vector.extract_strided_slice %4 {offsets = [0, 0, 0], sizes = [6, 8, 32], strides = [1, 1, 1]} : vector<6x8x128xf32> to vector<6x8x32xf32>
    %6 = arith.truncf %5 : vector<6x8x32xf32> to vector<6x8x32xbf16>
    %7 = vector.extract_strided_slice %4 {offsets = [0, 0, 32], sizes = [6, 8, 32], strides = [1, 1, 1]} : vector<6x8x128xf32> to vector<6x8x32xf32>
    %8 = arith.truncf %7 : vector<6x8x32xf32> to vector<6x8x32xbf16>
    %9 = vector.extract_strided_slice %4 {offsets = [0, 0, 64], sizes = [6, 8, 32], strides = [1, 1, 1]} : vector<6x8x128xf32> to vector<6x8x32xf32>
    %10 = arith.truncf %9 : vector<6x8x32xf32> to vector<6x8x32xbf16>
    "tpu.trace_start"() <{level = 10 : i32, message = "bqd,bkd->bqk"}> : () -> ()
    %cst_3 = arith.constant dense<0.000000e+00> : vector<6x8x8xf32>
    %11 = tpu.matmul %6, %8, %cst_3 {dimension_numbers = #tpu.dot_dimension_numbers<[2], [2], [1], [1], [0, 0, 0, 1, 1, 1], [0], [0]>} : vector<6x8x32xbf16>, vector<6x8x32xbf16>, vector<6x8x8xf32> -> vector<6x8x8xf32>
    "tpu.trace_stop"() : () -> ()
    %c0_4 = arith.constant 0 : index
    %c0_5 = arith.constant 0 : index
    %c0_6 = arith.constant 0 : index
    %12 = vector.load %arg2[%c0_4, %c0_5, %c0_6] : memref<6x1x8xf32, #tpu.memory_space<vmem>>, vector<6x1x8xf32>
    %13 = vector.broadcast %12 : vector<6x1x8xf32> to vector<6x8x8xf32>
    %14 = arith.addf %11, %13 : vector<6x8x8xf32>
    %cst_7 = arith.constant dense<0xFF800000> : vector<6x8xf32>
    %15 = vector.multi_reduction <maximumf>, %14, %cst_7 [2] : vector<6x8x8xf32> to vector<6x8xf32>
    %cst_8 = arith.constant 0xFF800000 : f32
    %16 = vector.broadcast %cst_8 : f32 to vector<6x8xf32>
    %17 = arith.maximumf %16, %15 : vector<6x8xf32>
    %18 = vector.shape_cast %17 : vector<6x8xf32> to vector<6x8x1xf32>
    %19 = vector.broadcast %18 : vector<6x8x1xf32> to vector<6x8x8xf32>
    %20 = arith.subf %14, %19 : vector<6x8x8xf32>
    %21 = math.exp %20 : vector<6x8x8xf32>
    %cst_9 = arith.constant dense<0.000000e+00> : vector<6x8xf32>
    %22 = vector.multi_reduction <add>, %21, %cst_9 [2] : vector<6x8x8xf32> to vector<6x8xf32>
    %23 = vector.shape_cast %22 : vector<6x8xf32> to vector<6x8x1xf32>
    %24 = vector.broadcast %23 : vector<6x8x1xf32> to vector<6x8x8xf32>
    %25 = arith.divf %21, %24 : vector<6x8x8xf32>
    %26 = arith.truncf %25 : vector<6x8x8xf32> to vector<6x8x8xbf16>
    "tpu.trace_start"() <{level = 10 : i32, message = "bqk,bkd->bqd"}> : () -> ()
    %cst_10 = arith.constant dense<0.000000e+00> : vector<6x8x32xf32>
    %27 = tpu.matmul %26, %10, %cst_10 {dimension_numbers = #tpu.dot_dimension_numbers<[2], [1], [1], [2], [0, 0, 0, 1, 1, 2], [0], [0]>} : vector<6x8x8xbf16>, vector<6x8x32xbf16>, vector<6x8x32xf32> -> vector<6x8x32xf32>
    "tpu.trace_stop"() : () -> ()
    %28 = vector.shape_cast %27 : vector<6x8x32xf32> to vector<48x32xf32>
    %29 = vector.extract_strided_slice %2 {offsets = [0, 96], sizes = [32, 32], strides = [1, 1]} : vector<32x128xbf16> to vector<32x32xbf16>
    %30 = arith.truncf %28 : vector<48x32xf32> to vector<48x32xbf16>
    %cst_11 = arith.constant dense<0.000000e+00> : vector<48x32xf32>
    %31 = tpu.matmul %30, %29, %cst_11 {dimension_numbers = #tpu.dot_dimension_numbers<[1], [0], [0], [1], [0, 0, 1, 1], [], []>} : vector<48x32xbf16>, vector<32x32xbf16>, vector<48x32xf32> -> vector<48x32xf32>
    %c0_12 = arith.constant 0 : index
    %c0_13 = arith.constant 0 : index
    %32 = vector.load %arg5[%c0_12, %c0_13] : memref<8x32xf32, #tpu.memory_space<vmem>>, vector<8x32xf32>
    %33 = vector.extract_strided_slice %32 {offsets = [0, 0], sizes = [1, 32], strides = [1, 1]} : vector<8x32xf32> to vector<1x32xf32>
    %34 = vector.extract_strided_slice %32 {offsets = [1, 0], sizes = [1, 32], strides = [1, 1]} : vector<8x32xf32> to vector<1x32xf32>
    %35 = vector.extract_strided_slice %32 {offsets = [2, 0], sizes = [1, 32], strides = [1, 1]} : vector<8x32xf32> to vector<1x32xf32>
    %36 = vector.extract_strided_slice %32 {offsets = [3, 0], sizes = [1, 32], strides = [1, 1]} : vector<8x32xf32> to vector<1x32xf32>
    %37 = vector.extract_strided_slice %32 {offsets = [4, 0], sizes = [1, 32], strides = [1, 1]} : vector<8x32xf32> to vector<1x32xf32>
    %38 = vector.extract_strided_slice %32 {offsets = [5, 0], sizes = [1, 32], strides = [1, 1]} : vector<8x32xf32> to vector<1x32xf32>
    %39 = arith.addf %0, %31 : vector<48x32xf32>
    %cst_14 = arith.constant dense<0.000000e+00> : vector<48xf32>
    %40 = vector.multi_reduction <add>, %39, %cst_14 [1] : vector<48x32xf32> to vector<48xf32>
    %41 = vector.shape_cast %40 : vector<48xf32> to vector<48x1xf32>
    %cst_15 = arith.constant 3.200000e+01 : f32
    %42 = vector.broadcast %cst_15 : f32 to vector<48x1xf32>
    %43 = arith.divf %41, %42 : vector<48x1xf32>
    %44 = vector.broadcast %43 : vector<48x1xf32> to vector<48x32xf32>
    %45 = arith.subf %39, %44 : vector<48x32xf32>
    %46 = arith.mulf %45, %45 : vector<48x32xf32>
    %cst_16 = arith.constant dense<0.000000e+00> : vector<48xf32>
    %47 = vector.multi_reduction <add>, %46, %cst_16 [1] : vector<48x32xf32> to vector<48xf32>
    %48 = vector.shape_cast %47 : vector<48xf32> to vector<48x1xf32>
    %cst_17 = arith.constant 3.200000e+01 : f32
    %49 = vector.broadcast %cst_17 : f32 to vector<48x1xf32>
    %50 = arith.divf %48, %49 : vector<48x1xf32>
    %51 = vector.broadcast %43 : vector<48x1xf32> to vector<48x32xf32>
    %52 = arith.subf %39, %51 : vector<48x32xf32>
    %cst_18 = arith.constant 9.99999996E-13 : f32
    %53 = vector.broadcast %cst_18 : f32 to vector<48x1xf32>
    %54 = arith.addf %50, %53 : vector<48x1xf32>
    %55 = math.rsqrt %54 : vector<48x1xf32>
    %56 = vector.broadcast %55 : vector<48x1xf32> to vector<48x32xf32>
    %57 = arith.mulf %52, %56 : vector<48x32xf32>
    %58 = vector.broadcast %33 : vector<1x32xf32> to vector<48x32xf32>
    %59 = arith.mulf %57, %58 : vector<48x32xf32>
    %60 = vector.broadcast %34 : vector<1x32xf32> to vector<48x32xf32>
    %61 = arith.addf %59, %60 : vector<48x32xf32>
    %62 = arith.truncf %61 : vector<48x32xf32> to vector<48x32xbf16>
    %c0_19 = arith.constant 0 : index
    %c0_20 = arith.constant 0 : index
    %63 = vector.load %arg6[%c0_19, %c0_20] : memref<32x64xbf16, #tpu.memory_space<vmem>>, vector<32x64xbf16>
    %cst_21 = arith.constant dense<0.000000e+00> : vector<48x64xf32>
    %64 = tpu.matmul %62, %63, %cst_21 {dimension_numbers = #tpu.dot_dimension_numbers<[1], [0], [0], [1], [0, 0, 1, 1], [], []>} : vector<48x32xbf16>, vector<32x64xbf16>, vector<48x64xf32> -> vector<48x64xf32>
    %c0_22 = arith.constant 0 : index
    %c0_23 = arith.constant 0 : index
    %65 = vector.load %arg7[%c0_22, %c0_23] : memref<1x64xf32, #tpu.memory_space<vmem>>, vector<1x64xf32>
    %66 = vector.broadcast %65 : vector<1x64xf32> to vector<48x64xf32>
    %67 = arith.addf %64, %66 : vector<48x64xf32>
    %68 = arith.mulf %67, %67 : vector<48x64xf32>
    %69 = arith.mulf %67, %68 : vector<48x64xf32>
    %cst_24 = arith.constant 4.471500e-02 : f32
    %70 = vector.broadcast %cst_24 : f32 to vector<48x64xf32>
    %71 = arith.mulf %70, %69 : vector<48x64xf32>
    %72 = arith.addf %67, %71 : vector<48x64xf32>
    %cst_25 = arith.constant 0.797884583 : f32
    %73 = vector.broadcast %cst_25 : f32 to vector<48x64xf32>
    %74 = arith.mulf %73, %72 : vector<48x64xf32>
    %75 = math.tanh %74 : vector<48x64xf32>
    %cst_26 = arith.constant 1.000000e+00 : f32
    %76 = vector.broadcast %cst_26 : f32 to vector<48x64xf32>
    %77 = arith.addf %76, %75 : vector<48x64xf32>
    %cst_27 = arith.constant 5.000000e-01 : f32
    %78 = vector.broadcast %cst_27 : f32 to vector<48x64xf32>
    %79 = arith.mulf %78, %77 : vector<48x64xf32>
    %80 = arith.mulf %67, %79 : vector<48x64xf32>
    %81 = arith.truncf %80 : vector<48x64xf32> to vector<48x64xbf16>
    %c0_28 = arith.constant 0 : index
    %c0_29 = arith.constant 0 : index
    %82 = vector.load %arg8[%c0_28, %c0_29] : memref<64x32xbf16, #tpu.memory_space<vmem>>, vector<64x32xbf16>
    %cst_30 = arith.constant dense<0.000000e+00> : vector<48x32xf32>
    %83 = tpu.matmul %81, %82, %cst_30 {dimension_numbers = #tpu.dot_dimension_numbers<[1], [0], [0], [1], [0, 0, 1, 1], [], []>} : vector<48x64xbf16>, vector<64x32xbf16>, vector<48x32xf32> -> vector<48x32xf32>
    %84 = vector.broadcast %37 : vector<1x32xf32> to vector<48x32xf32>
    %85 = arith.addf %83, %84 : vector<48x32xf32>
    %86 = arith.addf %61, %85 : vector<48x32xf32>
    %cst_31 = arith.constant dense<0.000000e+00> : vector<48xf32>
    %87 = vector.multi_reduction <add>, %86, %cst_31 [1] : vector<48x32xf32> to vector<48xf32>
    %88 = vector.shape_cast %87 : vector<48xf32> to vector<48x1xf32>
    %cst_32 = arith.constant 3.200000e+01 : f32
    %89 = vector.broadcast %cst_32 : f32 to vector<48x1xf32>
    %90 = arith.divf %88, %89 : vector<48x1xf32>
    %91 = vector.broadcast %90 : vector<48x1xf32> to vector<48x32xf32>
    %92 = arith.subf %86, %91 : vector<48x32xf32>
    %93 = arith.mulf %92, %92 : vector<48x32xf32>
    %cst_33 = arith.constant dense<0.000000e+00> : vector<48xf32>
    %94 = vector.multi_reduction <add>, %93, %cst_33 [1] : vector<48x32xf32> to vector<48xf32>
    %95 = vector.shape_cast %94 : vector<48xf32> to vector<48x1xf32>
    %cst_34 = arith.constant 3.200000e+01 : f32
    %96 = vector.broadcast %cst_34 : f32 to vector<48x1xf32>
    %97 = arith.divf %95, %96 : vector<48x1xf32>
    %98 = vector.broadcast %90 : vector<48x1xf32> to vector<48x32xf32>
    %99 = arith.subf %86, %98 : vector<48x32xf32>
    %cst_35 = arith.constant 9.99999996E-13 : f32
    %100 = vector.broadcast %cst_35 : f32 to vector<48x1xf32>
    %101 = arith.addf %97, %100 : vector<48x1xf32>
    %102 = math.rsqrt %101 : vector<48x1xf32>
    %103 = vector.broadcast %102 : vector<48x1xf32> to vector<48x32xf32>
    %104 = arith.mulf %99, %103 : vector<48x32xf32>
    %105 = vector.broadcast %35 : vector<1x32xf32> to vector<48x32xf32>
    %106 = arith.mulf %104, %105 : vector<48x32xf32>
    %107 = vector.broadcast %36 : vector<1x32xf32> to vector<48x32xf32>
    %108 = arith.addf %106, %107 : vector<48x32xf32>
    %109 = vector.shape_cast %108 : vector<48x32xf32> to vector<6x8x32xf32>
    %c0_36 = arith.constant 0 : index
    %c0_37 = arith.constant 0 : index
    %c0_38 = arith.constant 0 : index
    %110 = vector.load %arg3[%c0_36, %c0_37, %c0_38] : memref<6x1x8xf32, #tpu.memory_space<vmem>>, vector<6x1x8xf32>
    "tpu.trace_start"() <{level = 10 : i32, message = "bqs,bsh->bqh"}> : () -> ()
    %cst_39 = arith.constant dense<0.000000e+00> : vector<6x1x32xf32>
    %111 = tpu.matmul %110, %109, %cst_39 {dimension_numbers = #tpu.dot_dimension_numbers<[2], [1], [1], [2], [0, 0, 0, 1, 1, 2], [0], [0]>} : vector<6x1x8xf32>, vector<6x8x32xf32>, vector<6x1x32xf32> -> vector<6x1x32xf32>
    "tpu.trace_stop"() : () -> ()
    %112 = vector.shape_cast %111 : vector<6x1x32xf32> to vector<6x32xf32>
    %113 = vector.extract_strided_slice %109 {offsets = [0, 0, 0], sizes = [6, 1, 32], strides = [1, 1, 1]} : vector<6x8x32xf32> to vector<6x1x32xf32>
    %114 = vector.shape_cast %113 : vector<6x1x32xf32> to vector<6x32xf32>
    %115 = arith.truncf %114 : vector<6x32xf32> to vector<6x32xbf16>
    %c0_40 = arith.constant 0 : index
    %c0_41 = arith.constant 0 : index
    %116 = vector.load %arg9[%c0_40, %c0_41] : memref<32x32xbf16, #tpu.memory_space<vmem>>, vector<32x32xbf16>
    %cst_42 = arith.constant dense<0.000000e+00> : vector<6x32xf32>
    %117 = tpu.matmul %115, %116, %cst_42 {dimension_numbers = #tpu.dot_dimension_numbers<[1], [0], [0], [1], [0, 0, 1, 1], [], []>} : vector<6x32xbf16>, vector<32x32xbf16>, vector<6x32xf32> -> vector<6x32xf32>
    %118 = vector.broadcast %38 : vector<1x32xf32> to vector<6x32xf32>
    %119 = arith.addf %117, %118 : vector<6x32xf32>
    %120 = math.tanh %119 : vector<6x32xf32>
    %121 = vector.extract_strided_slice %120 {offsets = [0, 0], sizes = [2, 32], strides = [1, 1]} : vector<6x32xf32> to vector<2x32xf32>
    %122 = vector.extract_strided_slice %112 {offsets = [0, 0], sizes = [2, 32], strides = [1, 1]} : vector<6x32xf32> to vector<2x32xf32>
    %123 = vector.extract_strided_slice %112 {offsets = [2, 0], sizes = [2, 32], strides = [1, 1]} : vector<6x32xf32> to vector<2x32xf32>
    %124 = vector.extract_strided_slice %120 {offsets = [4, 0], sizes = [2, 32], strides = [1, 1]} : vector<6x32xf32> to vector<2x32xf32>
    %c0_43 = arith.constant 0 : index
    %c0_44 = arith.constant 0 : index
    %125 = vector.load %arg10[%c0_43, %c0_44] : memref<128x48xf32, #tpu.memory_space<vmem>>, vector<128x48xf32>
    %126 = vector.extract_strided_slice %125 {offsets = [0, 0], sizes = [32, 48], strides = [1, 1]} : vector<128x48xf32> to vector<32x48xf32>
    %cst_45 = arith.constant dense<0.000000e+00> : vector<2x48xf32>
    %127 = tpu.matmul %121, %126, %cst_45 {dimension_numbers = #tpu.dot_dimension_numbers<[1], [0], [0], [1], [0, 0, 1, 1], [], []>} : vector<2x32xf32>, vector<32x48xf32>, vector<2x48xf32> -> vector<2x48xf32>
    %128 = vector.extract_strided_slice %125 {offsets = [32, 0], sizes = [32, 48], strides = [1, 1]} : vector<128x48xf32> to vector<32x48xf32>
    %cst_46 = arith.constant dense<0.000000e+00> : vector<2x48xf32>
    %129 = tpu.matmul %122, %128, %cst_46 {dimension_numbers = #tpu.dot_dimension_numbers<[1], [0], [0], [1], [0, 0, 1, 1], [], []>} : vector<2x32xf32>, vector<32x48xf32>, vector<2x48xf32> -> vector<2x48xf32>
    %130 = arith.addf %127, %129 : vector<2x48xf32>
    %131 = vector.extract_strided_slice %125 {offsets = [64, 0], sizes = [32, 48], strides = [1, 1]} : vector<128x48xf32> to vector<32x48xf32>
    %cst_47 = arith.constant dense<0.000000e+00> : vector<2x48xf32>
    %132 = tpu.matmul %123, %131, %cst_47 {dimension_numbers = #tpu.dot_dimension_numbers<[1], [0], [0], [1], [0, 0, 1, 1], [], []>} : vector<2x32xf32>, vector<32x48xf32>, vector<2x48xf32> -> vector<2x48xf32>
    %133 = arith.addf %130, %132 : vector<2x48xf32>
    %134 = vector.extract_strided_slice %125 {offsets = [96, 0], sizes = [32, 48], strides = [1, 1]} : vector<128x48xf32> to vector<32x48xf32>
    %cst_48 = arith.constant dense<0.000000e+00> : vector<2x48xf32>
    %135 = tpu.matmul %124, %134, %cst_48 {dimension_numbers = #tpu.dot_dimension_numbers<[1], [0], [0], [1], [0, 0, 1, 1], [], []>} : vector<2x32xf32>, vector<32x48xf32>, vector<2x48xf32> -> vector<2x48xf32>
    %136 = arith.addf %133, %135 : vector<2x48xf32>
    %c0_49 = arith.constant 0 : index
    %c0_50 = arith.constant 0 : index
    %137 = vector.load %arg11[%c0_49, %c0_50] : memref<1x48xf32, #tpu.memory_space<vmem>>, vector<1x48xf32>
    %138 = vector.broadcast %137 : vector<1x48xf32> to vector<2x48xf32>
    %139 = arith.addf %136, %138 : vector<2x48xf32>
    %c0_51 = arith.constant 0 : index
    %c0_52 = arith.constant 0 : index
    %140 = vector.load %arg12[%c0_51, %c0_52] : memref<48x2xf32, #tpu.memory_space<vmem>>, vector<48x2xf32>
    %cst_53 = arith.constant dense<0.000000e+00> : vector<2x2xf32>
    %141 = tpu.matmul %139, %140, %cst_53 {dimension_numbers = #tpu.dot_dimension_numbers<[1], [0], [0], [1], [0, 0, 1, 1], [], []>} : vector<2x48xf32>, vector<48x2xf32>, vector<2x2xf32> -> vector<2x2xf32>
    %c0_54 = arith.constant 0 : index
    %c0_55 = arith.constant 0 : index
    %142 = vector.load %arg13[%c0_54, %c0_55] : memref<1x2xf32, #tpu.memory_space<vmem>>, vector<1x2xf32>
    %143 = vector.broadcast %142 : vector<1x2xf32> to vector<2x2xf32>
    %144 = arith.addf %141, %143 : vector<2x2xf32>
    %cst_56 = arith.constant dense<0xFF800000> : vector<2xf32>
    %145 = vector.multi_reduction <maximumf>, %144, %cst_56 [1] : vector<2x2xf32> to vector<2xf32>
    %cst_57 = arith.constant 0xFF800000 : f32
    %146 = vector.broadcast %cst_57 : f32 to vector<2xf32>
    %147 = arith.maximumf %146, %145 : vector<2xf32>
    %148 = vector.shape_cast %147 : vector<2xf32> to vector<2x1xf32>
    %149 = vector.broadcast %148 : vector<2x1xf32> to vector<2x2xf32>
    %150 = arith.subf %144, %149 : vector<2x2xf32>
    %151 = math.exp %150 : vector<2x2xf32>
    %cst_58 = arith.constant dense<0.000000e+00> : vector<2xf32>
    %152 = vector.multi_reduction <add>, %151, %cst_58 [1] : vector<2x2xf32> to vector<2xf32>
    %153 = vector.shape_cast %152 : vector<2xf32> to vector<2x1xf32>
    %154 = math.log %153 : vector<2x1xf32>
    %155 = vector.broadcast %154 : vector<2x1xf32> to vector<2x2xf32>
    %156 = arith.subf %150, %155 : vector<2x2xf32>
    %c0_59 = arith.constant 0 : index
    %c0_60 = arith.constant 0 : index
    %157 = vector.load %arg14[%c0_59, %c0_60] : memref<2x2xf32, #tpu.memory_space<vmem>>, vector<2x2xf32>
    tpu.vector_store %arg14[%c0_59, %c0_60], %156 {strides = array<i32>} : memref<2x2xf32, #tpu.memory_space<vmem>>, vector<2x2xf32>,
    return
  }
  func.func @transform_0(%arg0: i32) -> (i32, i32) {
    %c0_i32 = arith.constant 0 : i32
    %c0_i32_0 = arith.constant 0 : i32
    %c0_i32_1 = arith.constant 0 : i32
    return %c0_i32, %c0_i32_0 : i32, i32
  }
  func.func @transform_1(%arg0: i32) -> (i32, i32, i32) {
    %c0_i32 = arith.constant 0 : i32
    %c0_i32_0 = arith.constant 0 : i32
    %c0_i32_1 = arith.constant 0 : i32
    %c0_i32_2 = arith.constant 0 : i32
    return %c0_i32, %c0_i32_0, %c0_i32_1 : i32, i32, i32
  }
  func.func @transform_2(%arg0: i32) -> (i32, i32, i32) {
    %c0_i32 = arith.constant 0 : i32
    %c0_i32_0 = arith.constant 0 : i32
    %c0_i32_1 = arith.constant 0 : i32
    %c0_i32_2 = arith.constant 0 : i32
    return %c0_i32, %c0_i32_0, %c0_i32_1 : i32, i32, i32
  }
  func.func @transform_3(%arg0: i32) -> (i32, i32) {
    %c0_i32 = arith.constant 0 : i32
    %c0_i32_0 = arith.constant 0 : i32
    %c0_i32_1 = arith.constant 0 : i32
    return %c0_i32, %c0_i32_0 : i32, i32
  }
  func.func @transform_4(%arg0: i32) -> (i32, i32) {
    %c0_i32 = arith.constant 0 : i32
    %c0_i32_0 = arith.constant 0 : i32
    %c0_i32_1 = arith.constant 0 : i32
    return %c0_i32, %c0_i32_0 : i32, i32
  }
  func.func @transform_5(%arg0: i32) -> (i32, i32) {
    %c0_i32 = arith.constant 0 : i32
    %c0_i32_0 = arith.constant 0 : i32
    %c0_i32_1 = arith.constant 0 : i32
    return %c0_i32, %c0_i32_0 : i32, i32
  }
  func.func @transform_6(%arg0: i32) -> (i32, i32) {
    %c0_i32 = arith.constant 0 : i32
    %c0_i32_0 = arith.constant 0 : i32
    %c0_i32_1 = arith.constant 0 : i32
    return %c0_i32, %c0_i32_0 : i32, i32
  }
  func.func @transform_7(%arg0: i32) -> (i32, i32) {
    %c0_i32 = arith.constant 0 : i32
    %c0_i32_0 = arith.constant 0 : i32
    %c0_i32_1 = arith.constant 0 : i32
    return %c0_i32, %c0_i32_0 : i32, i32
  }
  func.func @transform_8(%arg0: i32) -> (i32, i32) {
    %c0_i32 = arith.constant 0 : i32
    %c0_i32_0 = arith.constant 0 : i32
    %c0_i32_1 = arith.constant 0 : i32
    return %c0_i32, %c0_i32_0 : i32, i32
  }
  func.func @transform_9(%arg0: i32) -> (i32, i32) {
    %c0_i32 = arith.constant 0 : i32
    %c0_i32_0 = arith.constant 0 : i32
    %c0_i32_1 = arith.constant 0 : i32
    return %c0_i32, %c0_i32_0 : i32, i32
  }
  func.func @transform_10(%arg0: i32) -> (i32, i32) {
    %c0_i32 = arith.constant 0 : i32
    %c0_i32_0 = arith.constant 0 : i32
    %c0_i32_1 = arith.constant 0 : i32
    return %c0_i32, %c0_i32_0 : i32, i32
  }
  func.func @transform_11(%arg0: i32) -> (i32, i32) {
    %c0_i32 = arith.constant 0 : i32
    %c0_i32_0 = arith.constant 0 : i32
    %c0_i32_1 = arith.constant 0 : i32
    return %c0_i32, %c0_i32_0 : i32, i32
  }
  func.func @transform_12(%arg0: i32) -> (i32, i32) {
    %c0_i32 = arith.constant 0 : i32
    %c0_i32_0 = arith.constant 0 : i32
    %c0_i32_1 = arith.constant 0 : i32
    return %c0_i32, %c0_i32_0 : i32, i32
  }
  func.func @transform_13(%arg0: i32) -> (i32, i32) {
    %c0_i32 = arith.constant 0 : i32
    %c0_i32_0 = arith.constant 0 : i32
    %c0_i32_1 = arith.constant 0 : i32
    return %c0_i32, %c0_i32_0 : i32, i32
  }
}

</mosaic_0001>

<bundles_post_ra>
// kernel: forward.1
= control target key start
LH: loop header
LB: loop body
LE: loop exit
PB: predicated region body
PF: predicated region fallthrough
CT: control target
= control target key end

     0   :  { %v2716_v1 = vmov 0.0   ;;  %vm2717_vm0 = vmmov 0   ;;  %vm71_vm1 = vcmask 261120   ;;  %s3318_s0 = inlined_call_operand.vmem [shape: f32[48,32], index: 0, kind: input, shape index: {}]   ;;  %s3319_s1 = inlined_call_operand.vmem [shape: f32[6,1,8], index: 1, kind: input, shape index: {}]   ;;  %s3320_s2 = inlined_call_operand.vmem [shape: f32[6,1,8], index: 2, kind: input, shape index: {}]   ;;  %s3321_s3 = inlined_call_operand.vmem [shape: bf16[32,128], index: 3, kind: input, shape index: {}]   ;;  %s3322_s4 = inlined_call_operand.vmem [shape: f32[8,32], index: 4, kind: input, shape index: {}]   ;;  %s3323_s5 = inlined_call_operand.vmem [shape: bf16[32,64], index: 5, kind: input, shape index: {}]   ;;  %s3324_s6 = inlined_call_operand.vmem [shape: f32[1,64], index: 6, kind: input, shape index: {}]   ;;  %s3325_s7 = inlined_call_operand.vmem [shape: bf16[64,32], index: 7, kind: input, shape index: {}]   ;;  %s3326_s8 = inlined_call_operand.vmem [shape: bf16[32,32], index: 8, kind: input, shape index: {}]   ;;  %s3327_s9 = inlined_call_operand.vmem [shape: f32[128,48], index: 9, kind: input, shape index: {}]   ;;  %s3328_s10 = inlined_call_operand.vmem [shape: f32[1,48], index: 10, kind: input, shape index: {}]   ;;  %s3329_s11 = inlined_call_operand.vmem [shape: f32[48,2], index: 11, kind: input, shape index: {}]   ;;  %s3330_s12 = inlined_call_operand.vmem [shape: f32[1,2], index: 12, kind: input, shape index: {}]   ;;  %s3331_s13 = inlined_call_operand.hbm [shape: f32[2,2], index: 13, kind: output, shape index: {}]  }
   0x1   :  { %v2796_v0 = vld [vmem:[%s3321_s3] sm:$0xff]   ;;  %2349 = vmatprep.subr.bf16.mxu0 %v2716_v1  ;;  %2365 = vmatprep.subr.bf16.mxu1 %v2716_v1  ;;  %v2804_v2 = vld [vmem:[%s3321_s3 + $0x8] sm:$0xff]  }
   0x2   :  { %2350 = vmatpush3.bf16.msra.mxu0 %v2796_v0  ;;  %2353 = vmatprep.mubr.msk.bf16.mxu0 %vm2717_vm0, %v2716_v1  ;;  %v2811_v3 = vld [vmem:[%s3318_s0] sm:$0xff]  ;;  %v2816_v4 = vld [vmem:[%s3318_s0 + $0x8] sm:$0xff] }
   0x3   :  { %2351 = vmatprep.subr.bf16.mxu0 %v2716_v1  ;;  %2367 = vmatprep.mubr.msk.bf16.mxu1 %vm2717_vm0, %v2716_v1  ;;  %v52_v5 = vpack.c.bf16 %v2816_v4, %v2811_v3 }
   0x6   :  { %2352 = vmatpush3.bf16.msra.mxu0 %v2804_v2 }
   0x7   :  { %2383 = vmatprep.subr.bf16.mxu0 %v2716_v1 }
   0x9   :  { %2354 = vmatmul.mubr.msk.bf16.vlgmr.msra.gmra.mrb[0].mxu0 %vm71_vm1, %v52_v5 }
   0xa   :  { %18 = vsyncpa [#allocation3], 0  ;;  %2357 = vmatprep.mubr.msk.bf16.mxu0 %vm2717_vm0, %v2716_v1  ;;  %v2831_v6 = vld [vmem:[%s3318_s0 + $0x10] sm:$0xff]  ;;  %v2836_v7 = vld [vmem:[%s3318_s0 + $0x18] sm:$0xff]  ;;  %s2718_s23 = smov 96   ;;  %vm480_vm2 = vcmask 64512  }
   0xb   :  { %v53_v8 = vpack.c.bf16 %v2836_v7, %v2831_v6  ;;  %v2846_v9 = vld [vmem:[%s3318_s0 + $0x20] sm:$0xff]  ;;  %v2851_v10 = vld [vmem:[%s3318_s0 + $0x28] sm:$0xff]  ;;  %s2719_s17 = smov 64   ;;  %vm558_vm3 = vcmask 1043456   ;;  %vm1208_vm4 = vcmask 523264   ;;  %vm1702_vm5 = vcmask 1041409  }
   0xc   :  { %v54_v11 = vpack.c.bf16 %v2851_v10, %v2846_v9  ;;  %v2217_v42 = vld [vmem:[%s3319_s1] ss:$0 sm:$0xff]  ;;  %v2218_v49 = vld [vmem:[%s3319_s1 + $0x1] ss:$0 sm:$0xff]  ;;  %v2219_v59 = vld [vmem:[%s3319_s1 + $0x2] ss:$0 sm:$0xff] }
   0xd   :  { %v2220_v61 = vld [vmem:[%s3319_s1 + $0x3] ss:$0 sm:$0xff]  ;;  %vm1705_vm6 = vcmask 1042434   ;;  %vm1708_vm7 = vcmask 1043459   ;;  %vm1711_vm8 = vcmask 1044484   ;;  %vm1714_vm9 = vcmask 1045509  }
   0xe   :  { %vm2110_vm10 = vcmask 392192   ;;  %vm2184_vm11 = vcmask 9216  }
  0x11   :  { %2358 = vmatmul.mubr.msk.bf16.gmra.mrb[4].mxu0 %vm71_vm1, %v53_v8 }
  0x12   :  { %2361 = vmatprep.mubr.msk.bf16.mxu0 %vm2717_vm0, %v2716_v1 }
  0x19   :  { %2362 = vmatmul.mubr.msk.bf16.gmra.mrb[8].mxu0 %vm71_vm1, %v54_v11 }
  0x1a   :  { %2385 = vmatprep.mubr.msk.bf16.mxu0 %vm2717_vm0, %v2716_v1 }
  0xdc   :  { %v115_v12 = vpop.f32.mrb[0].mxu0 }
  0xdd   :  { %v2858_v13 = vpack.c.bf16 %v115_v12, %v115_v12  ;;  %v2355_v14 = vpop.f32.mrb[1].mxu0 }
  0xde   :  { %v118_v15 = vpop.f32.mrb[2].mxu0 }
  0xdf   :  { %187 = vrot.lane.b32.xlu0 %v2858_v13, %s2718_s23  ;;  %v2356_v16 = vpop.f32.mrb[3].mxu0  ;;  %v2861_v17 = vpack.c.bf16 %v118_v15, %v118_v15  ;;  %v2222_v15 = vld [vmem:[%s3319_s1 + $0x5] ss:$0 sm:$0xff] }
  0xe3   :  { %236 = vrot.lane.b32.xlu0 %v2861_v17, %s2718_s23 }
  0xe4   :  { %v123_v18 = vpop.f32.mrb[4].mxu0 }
  0xe5   :  { %v2864_v19 = vpack.c.bf16 %v123_v18, %v123_v18  ;;  %v2359_v20 = vpop.f32.mrb[5].mxu0 }
  0xe6   :  { %v126_v21 = vpop.f32.mrb[6].mxu0 }
  0xe7   :  { %285 = vrot.lane.b32.xlu1 %v2864_v19, %s2718_s23  ;;  %v2867_v22 = vpack.c.bf16 %v126_v21, %v126_v21  ;;  %v2360_v23 = vpop.f32.mrb[7].mxu0  ;;  %v2221_v21 = vld [vmem:[%s3319_s1 + $0x4] ss:$0 sm:$0xff]  ;;  %s2720_s1 = smov 32  }
  0xeb   :  { %334 = vrot.lane.b32.xlu1 %v2867_v22, %s2718_s23 }
  0xec   :  { %v131_v24 = vpop.f32.mrb[8].mxu0 }
  0xed   :  { %v2870_v25 = vpack.c.bf16 %v131_v24, %v131_v24  ;;  %v2363_v26 = vpop.f32.mrb[9].mxu0 }
  0xee   :  { %v134_v27 = vpop.f32.mrb[10].mxu0 }
  0xef   :  { %v2872_v28 = vpack.c.bf16 %v134_v27, %v134_v27  ;;  %383 = vrot.lane.b32.xlu0 %v2870_v25, %s2718_s23  ;;  %v2364_v29 = vpop.f32.mrb[11].mxu0 }
  0xf1   :  { %432 = vrot.lane.b32.xlu1 %v2872_v28, %s2718_s23 }
 0x151   :  { %v188_v30 = vpop.permute.xlu0 %187 }
 0x152   :  { %v193_v31 = vsel %vm71_vm1, %v188_v30, 0 }
 0x153   :  { %2366 = vmatpush3.bf16.xpose.msra.mxu1 %v193_v31 }
 0x154   :  { %2371 = vmatprep.subr.bf16.mxu1 %v2716_v1 }
 0x155   :  { %v237_v32 = vpop.permute.xlu0 %236 }
 0x156   :  { %v242_v34 = vsel %vm71_vm1, %v237_v32, 0 }
 0x159   :  { %v286_v33 = vpop.permute.xlu1 %285 }
 0x15a   :  { %2368 = vmatmul.mubr.msk.bf16.vlgmr.msra.gmra.mrb[0].mxu1 %vm71_vm1, %v2858_v13  ;;  %v291_v37 = vsel %vm71_vm1, %v286_v33, 0 }
 0x15b   :  { %2372 = vmatpush3.bf16.xpose.msra.mxu1 %v242_v34  ;;  %2373 = vmatprep.mubr.msk.bf16.mxu1 %vm2717_vm0, %v2716_v1 }
 0x15c   :  { %2377 = vmatprep.subr.bf16.mxu1 %v2716_v1 }
 0x15d   :  { %v335_v35 = vpop.permute.xlu1 %334 }
 0x15e   :  { %v340_v36 = vsel %vm71_vm1, %v335_v35, 0 }
 0x15f   :  { %2384 = vmatpush3.bf16.xpose.msra.mxu0 %v340_v36 }
 0x160   :  { %2395 = vmatprep.subr.bf16.mxu0 %v2716_v1 }
 0x161   :  { %v384_v40 = vpop.permute.xlu0 %383 }
 0x162   :  { %2374 = vmatmul.mubr.msk.bf16.vlgmr.msra.gmra.mrb[4].mxu1 %vm71_vm1, %v2861_v17  ;;  %v389_v41 = vsel %vm71_vm1, %v384_v40, 0 }
 0x163   :  { %2378 = vmatpush3.bf16.xpose.msra.mxu1 %v291_v37  ;;  %v433_v38 = vpop.permute.xlu1 %432  ;;  %2379 = vmatprep.mubr.msk.bf16.mxu1 %vm2717_vm0, %v2716_v1 }
 0x164   :  { %v438_v39 = vsel %vm71_vm1, %v433_v38, 0  ;;  %2389 = vmatprep.subr.bf16.mxu1 %v2716_v1 }
 0x166   :  { %2386 = vmatmul.mubr.msk.bf16.vlgmr.msra.gmra.mrb[12].mxu0 %vm71_vm1, %v2867_v22 }
 0x167   :  { %2396 = vmatpush3.bf16.xpose.msra.mxu0 %v438_v39  ;;  %2397 = vmatprep.mubr.msk.bf16.mxu0 %vm2717_vm0, %v2716_v1 }
 0x168   :  { %2407 = vmatprep.subr.bf16.mxu0 %v2716_v1 }
 0x16a   :  { %2380 = vmatmul.mubr.msk.bf16.vlgmr.msra.gmra.mrb[8].mxu1 %vm71_vm1, %v2864_v19 }
 0x16b   :  { %2390 = vmatpush3.bf16.xpose.msra.mxu1 %v389_v41  ;;  %2391 = vmatprep.mubr.msk.bf16.mxu1 %vm2717_vm0, %v2716_v1 }
 0x16c   :  { %2401 = vmatprep.subr.bf16.mxu1 %v2716_v1 }
 0x16e   :  { %2398 = vmatmul.mubr.msk.bf16.vlgmr.msra.gmra.mrb[16].mxu0 %vm71_vm1, %v2872_v28 }
 0x16f   :  { %2409 = vmatprep.mubr.msk.bf16.mxu0 %vm2717_vm0, %v2716_v1 }
 0x172   :  { %2392 = vmatmul.mubr.msk.bf16.vlgmr.msra.gmra.mrb[12].mxu1 %vm71_vm1, %v2870_v25 }
 0x173   :  { %2403 = vmatprep.mubr.msk.bf16.mxu1 %vm2717_vm0, %v2716_v1 }
 0x22d   :  { %v229_v43 = vpop.f32.mrb[0].mxu1 }
 0x22e   :  { %v230_v44 = vadd.f32 %v2217_v42, %v229_v43  ;;  %v2369_v45 = vpop.f32.mrb[1].mxu1 }
 0x22f   :  { %v232_v46 = vpop.f32.mrb[2].mxu1 }
 0x230   :  { %v2370_v47 = vpop.f32.mrb[3].mxu1  ;;  %v481_v48 = vsel %vm480_vm2, %v230_v44, -inf }
 0x231   :  { %482 = vmax.xlane.f32.xlu0 %v481_v48 }
 0x235   :  { %v278_v50 = vpop.f32.mrb[4].mxu1 }
 0x236   :  { %v279_v51 = vadd.f32 %v2218_v49, %v278_v50  ;;  %v2375_v52 = vpop.f32.mrb[5].mxu1 }
 0x237   :  { %v281_v53 = vpop.f32.mrb[6].mxu1 }
 0x238   :  { %v2376_v54 = vpop.f32.mrb[7].mxu1  ;;  %v484_v55 = vsel %vm480_vm2, %v279_v51, -inf }
 0x239   :  { %485 = vmax.xlane.f32.xlu1 %v484_v55  ;;  %v376_v56 = vpop.f32.mrb[12].mxu0 }
 0x23a   :  { %v2387_v57 = vpop.f32.mrb[13].mxu0  ;;  %v377_v11 = vadd.f32 %v2220_v61, %v376_v56 }
 0x23b   :  { %v379_v58 = vpop.f32.mrb[14].mxu0 }
 0x23c   :  { %v2388_v60 = vpop.f32.mrb[15].mxu0  ;;  %v490_v26 = vsel %vm480_vm2, %v377_v11, -inf }
 0x23d   :  { %v327_v62 = vpop.f32.mrb[8].mxu1 }
 0x23e   :  { %v328_v63 = vadd.f32 %v2219_v59, %v327_v62  ;;  %v2381_v5 = vpop.f32.mrb[9].mxu1 }
 0x23f   :  { %v330_v8 = vpop.f32.mrb[10].mxu1 }
 0x240   :  { %v2382_v12 = vpop.f32.mrb[11].mxu1  ;;  %v487_v14 = vsel %vm480_vm2, %v328_v63, -inf }
 0x241   :  { %488 = vmax.xlane.f32.xlu0 %v487_v14  ;;  %v474_v16 = vpop.f32.mrb[16].mxu0 }
 0x242   :  { %v2399_v18 = vpop.f32.mrb[17].mxu0  ;;  %v475_v23 = vadd.f32 %v2222_v15, %v474_v16 }
 0x243   :  { %v477_v20 = vpop.f32.mrb[18].mxu0 }
 0x244   :  { %v2400_v24 = vpop.f32.mrb[19].mxu0  ;;  %v496_v34 = vsel %vm480_vm2, %v475_v23, -inf }
 0x245   :  { %v425_v27 = vpop.f32.mrb[12].mxu1  ;;  %491 = vmax.xlane.f32.xlu0 %v490_v26 }
 0x246   :  { %v426_v29 = vadd.f32 %v2221_v21, %v425_v27  ;;  %v2393_v30 = vpop.f32.mrb[13].mxu1 }
 0x247   :  { %v428_v31 = vpop.f32.mrb[14].mxu1 }
 0x248   :  { %v2394_v32 = vpop.f32.mrb[15].mxu1  ;;  %v493_v33 = vsel %vm480_vm2, %v426_v29, -inf }
 0x249   :  { %494 = vmax.xlane.f32.xlu1 %v493_v33  ;;  %497 = vmax.xlane.f32.xlu0 %v496_v34 }
 0x25a   :  { %553 = vrot.lane.b32.xlu1 %v2858_v13, %s2719_s17 }
 0x2be   :  { %v483_v35 = vpop.xlane.xlu0 %482 }
 0x2bf   :  { %v499_v36 = vsub.f32 %v230_v44, %v483_v35 }
 0x2c1   :  { %v505_v37 = vmul.f32 1.442695, %v499_v36 }
 0x2c3   :  { %2626 = vpow2.f32 %v505_v37 }
 0x2c6   :  { %v486_v38 = vpop.xlane.xlu1 %485 }
 0x2c7   :  { %v500_v39 = vsub.f32 %v279_v51, %v486_v38 }
 0x2c9   :  { %v507_v40 = vmul.f32 1.442695, %v500_v39 }
 0x2cb   :  { %2628 = vpow2.f32 %v507_v40 }
 0x2cd   :  { %v2627_v41 = vpop.eup %2626 }
 0x2ce   :  { %v517_v42 = vsel %vm480_vm2, %v2627_v41, 0.0  ;;  %v489_v44 = vpop.xlane.xlu0 %488 }
 0x2cf   :  { %518 = vadd.xlane.f32.xlu1 %v517_v42  ;;  %v501_v49 = vsub.f32 %v328_v63, %v489_v44 }
 0x2d1   :  { %v509_v51 = vmul.f32 1.442695, %v501_v49 }
 0x2d2   :  { %v492_v48 = vpop.xlane.xlu0 %491 }
 0x2d3   :  { %v502_v50 = vsub.f32 %v377_v11, %v492_v48  ;;  %2630 = vpow2.f32 %v509_v51 }
 0x2d5   :  { %v2629_v43 = vpop.eup %2628  ;;  %v511_v54 = vmul.f32 1.442695, %v502_v50 }
 0x2d6   :  { %v495_v45 = vpop.xlane.xlu1 %494  ;;  %v520_v46 = vsel %vm480_vm2, %v2629_v43, 0.0  ;;  %v498_v53 = vpop.xlane.xlu0 %497 }
 0x2d7   :  { %521 = vadd.xlane.f32.xlu0 %v520_v46  ;;  %v503_v52 = vsub.f32 %v426_v29, %v495_v45  ;;  %v504_v56 = vsub.f32 %v475_v23, %v498_v53  ;;  %2632 = vpow2.f32 %v511_v54 }
 0x2d9   :  { %v513_v55 = vmul.f32 1.442695, %v503_v52 }
 0x2da   :  { %v554_v47 = vpop.permute.xlu1 %553 }
 0x2db   :  { %v560_v13 = vsel %vm558_vm3, %v554_v47, 0  ;;  %2634 = vpow2.f32 %v513_v55 }
 0x2dc   :  { %2402 = vmatpush3.bf16.msra.mxu1 %v560_v13 }
 0x2dd   :  { %2413 = vmatprep.subr.bf16.mxu1 %v2716_v1  ;;  %v2631_v57 = vpop.eup %2630 }
 0x2de   :  { %v523_v58 = vsel %vm480_vm2, %v2631_v57, 0.0 }
 0x2e0   :  { %650 = vrot.lane.b32.xlu1 %v2864_v19, %s2719_s17  ;;  %v515_v19 = vmul.f32 1.442695, %v504_v56 }
 0x2e2   :  { %2636 = vpow2.f32 %v515_v19 }
 0x2e4   :  { %698 = vrot.lane.b32.xlu1 %v2867_v22, %s2719_s17  ;;  %v2633_v22 = vpop.eup %2632 }
 0x2e5   :  { %v2635_v59 = vpop.eup %2634  ;;  %v526_v60 = vsel %vm480_vm2, %v2633_v22, 0.0 }
 0x2ec   :  { %v2951_v61 = vpop.eup %2636 }
 0x2ed   :  { %602 = vrot.lane.b32.xlu0 %v2861_v17, %s2719_s17  ;;  %v529_v17 = vsel %vm480_vm2, %v2635_v59, 0.0  ;;  %v532_v62 = vsel %vm480_vm2, %v2951_v61, 0.0 }
 0x308   :  { %524 = vadd.xlane.f32.xlu1 %v523_v58 }
 0x30c   :  { %530 = vadd.xlane.f32.xlu1 %v529_v17  ;;  %527 = vadd.xlane.f32.xlu0 %v526_v60 }
 0x310   :  { %533 = vadd.xlane.f32.xlu0 %v532_v62 }
 0x31d   :  { %794 = vrot.lane.b32.xlu1 %v2872_v28, %s2719_s17 }
 0x321   :  { %847 = vrot.lane.b32.xlu1 %v2804_v2, %s2720_s1 }
 0x326   :  { %746 = vrot.lane.b32.xlu0 %v2870_v25, %s2719_s17 }
 0x32a   :  { %845 = vrot.lane.b32.xlu0 %v2796_v0, %s2720_s1 }
 0x35c   :  { %v519_v63 = vpop.xlane.xlu1 %518 }
 0x35d   :  { %2638 = vrcp.f32 %v519_v63 }
 0x360   :  { %v651_v14 = vpop.permute.xlu1 %650 }
 0x361   :  { %v656_v25 = vsel %vm558_vm3, %v651_v14, 0 }
 0x364   :  { %v522_v5 = vpop.xlane.xlu0 %521  ;;  %v699_v16 = vpop.permute.xlu1 %698 }
 0x365   :  { %2640 = vrcp.f32 %v522_v5  ;;  %v704_v20 = vsel %vm558_vm3, %v699_v16, 0 }
 0x367   :  { %v2639_v8 = vpop.eup %2638 }
 0x368   :  { %v536_v11 = vmul.f32 %v2639_v8, %v2627_v41  ;;  %v603_v12 = vpop.permute.xlu0 %602 }
 0x369   :  { %v608_v15 = vsel %vm558_vm3, %v603_v12, 0 }
 0x36a   :  { %2408 = vmatpush3.bf16.msra.mxu0 %v608_v15  ;;  %v547_v28 = vpack.c.bf16 %v536_v11, %v536_v11 }
 0x36b   :  { %2419 = vmatprep.subr.bf16.mxu0 %v2716_v1 }
 0x36c   :  { %2404 = vmatmul.mubr.msk.bf16.vlgmr.msra.gmra.mrb[16].mxu1 %vm480_vm2, %v547_v28 }
 0x36d   :  { %2414 = vmatpush3.bf16.msra.mxu1 %v656_v25  ;;  %2415 = vmatprep.mubr.msk.bf16.mxu1 %vm2717_vm0, %v2716_v1 }
 0x36e   :  { %2425 = vmatprep.subr.bf16.mxu1 %v2716_v1 }
 0x36f   :  { %v2641_v0 = vpop.eup %2640 }
 0x370   :  { %v538_v2 = vmul.f32 %v2641_v0, %v2629_v43 }
 0x372   :  { %v548_v18 = vpack.c.bf16 %v538_v2, %v538_v2 }
 0x374   :  { %2410 = vmatmul.mubr.msk.bf16.vlgmr.msra.gmra.mrb[20].mxu0 %vm480_vm2, %v548_v18 }
 0x375   :  { %2420 = vmatpush3.bf16.msra.mxu0 %v704_v20  ;;  %2421 = vmatprep.mubr.msk.bf16.mxu0 %vm2717_vm0, %v2716_v1 }
 0x376   :  { %2431 = vmatprep.subr.bf16.mxu0 %v2716_v1 }
 0x395   :  { %v525_v21 = vpop.xlane.xlu1 %524 }
 0x396   :  { %2642 = vrcp.f32 %v525_v21 }
 0x399   :  { %v531_v23 = vpop.xlane.xlu1 %530  ;;  %v528_v24 = vpop.xlane.xlu0 %527 }
 0x39a   :  { %2644 = vrcp.f32 %v531_v23 }
 0x39b   :  { %2646 = vrcp.f32 %v528_v24 }
 0x39d   :  { %v534_v26 = vpop.xlane.xlu0 %533  ;;  %v795_v37 = vpop.permute.xlu1 %794 }
 0x39e   :  { %2648 = vrcp.f32 %v534_v26  ;;  %v800_v40 = vsel %vm558_vm3, %v795_v37, 0 }
 0x3a0   :  { %v2643_v27 = vpop.eup %2642 }
 0x3a1   :  { %v540_v29 = vmul.f32 %v2643_v27, %v2631_v57  ;;  %v747_v30 = vpop.permute.xlu0 %746  ;;  %v848_v46 = vpop.permute.xlu1 %847 }
 0x3a2   :  { %v752_v34 = vsel %vm558_vm3, %v747_v30, 0 }
 0x3a3   :  { %v549_v31 = vpack.c.bf16 %v540_v29, %v540_v29 }
 0x3a4   :  { %v2645_v32 = vpop.eup %2644 }
 0x3a5   :  { %v2647_v33 = vpop.eup %2646  ;;  %2416 = vmatmul.mubr.msk.bf16.vlgmr.msra.gmra.mrb[20].mxu1 %vm480_vm2, %v549_v31  ;;  %v544_v36 = vmul.f32 %v2645_v32, %v2635_v59  ;;  %v846_v45 = vpop.permute.xlu0 %845 }
 0x3a6   :  { %v542_v35 = vmul.f32 %v2647_v33, %v2633_v22  ;;  %2426 = vmatpush3.bf16.msra.mxu1 %v752_v34  ;;  %2427 = vmatprep.mubr.msk.bf16.mxu1 %vm2717_vm0, %v2716_v1 }
 0x3a7   :  { %2437 = vmatprep.subr.bf16.mxu1 %v2716_v1  ;;  %v551_v41 = vpack.c.bf16 %v544_v36, %v544_v36 }
 0x3a8   :  { %v550_v38 = vpack.c.bf16 %v542_v35, %v542_v35  ;;  %v2649_v39 = vpop.eup %2648 }
 0x3a9   :  { %v546_v42 = vmul.f32 %v2649_v39, %v2951_v61 }
 0x3aa   :  { %2422 = vmatmul.mubr.msk.bf16.vlgmr.msra.gmra.mrb[24].mxu0 %vm480_vm2, %v550_v38 }
 0x3ab   :  { %2432 = vmatpush3.bf16.msra.mxu0 %v800_v40  ;;  %2433 = vmatprep.mubr.msk.bf16.mxu0 %vm2717_vm0, %v2716_v1  ;;  %v552_v43 = vpack.c.bf16 %v546_v42, %v546_v42 }
 0x3ac   :  { %2453 = vmatprep.subr.bf16.mxu0 %v2716_v1 }
 0x3ad   :  { %2428 = vmatmul.mubr.msk.bf16.vlgmr.msra.gmra.mrb[24].mxu1 %vm480_vm2, %v551_v41 }
 0x3ae   :  { %2441 = vmatprep.mubr.msk.bf16.mxu1 %vm2717_vm0, %v2716_v1  ;;  %2438 = vmatpush3.bf16.msra.mxu1 %v846_v45  ;;  %v2618_v45 = vld [vmem:[%s3323_s5] sm:$0xff]  }
 0x3af   :  { %2439 = vmatprep.subr.bf16.mxu1 %v2716_v1 }
 0x3b2   :  { %2434 = vmatmul.mubr.msk.bf16.vlgmr.msra.gmra.mrb[28].mxu0 %vm480_vm2, %v552_v43  ;;  %2440 = vmatpush3.bf16.msra.mxu1 %v848_v46  ;;  %v2619_v46 = vld [vmem:[%s3323_s5 + $0x8] sm:$0xff]  }
 0x3b3   :  { %2457 = vmatprep.mubr.msk.bf16.mxu0 %vm2717_vm0, %v2716_v1  ;;  %2469 = vmatprep.subr.bf16.mxu1 %v2716_v1 }
 0x3b4   :  { %2454 = vmatpush3.bf16.msra.mxu0 %v2618_v45 }
 0x3b5   :  { %2455 = vmatprep.subr.bf16.mxu0 %v2716_v1 }
 0x3b8   :  { %2456 = vmatpush3.bf16.msra.mxu0 %v2619_v46 }
 0x3b9   :  { %2489 = vmatprep.subr.mxu0 %v2716_v1 }
 0x43f   :  { %v596_v47 = vpop.f32.mrb[16].mxu1 }
 0x440   :  { %v2405_v13 = vpop.f32.mrb[17].mxu1 }
 0x441   :  { %v599_v44 = vpop.f32.mrb[18].mxu1 }
 0x442   :  { %v2406_v48 = vpop.f32.mrb[19].mxu1 }
 0x447   :  { %v644_v49 = vpop.f32.mrb[20].mxu0 }
 0x448   :  { %v842_v50 = vpack.c.bf16 %v644_v49, %v596_v47  ;;  %v2411_v51 = vpop.f32.mrb[21].mxu0 }
 0x449   :  { %v647_v52 = vpop.f32.mrb[22].mxu0 }
 0x44a   :  { %v2412_v53 = vpop.f32.mrb[23].mxu0  ;;  %2442 = vmatmul.mubr.msk.bf16.vlgmr.msra.gmra.mrb[28].mxu1 %vm71_vm1, %v842_v50 }
 0x44b   :  { %2445 = vmatprep.mubr.msk.bf16.mxu1 %vm2717_vm0, %v2716_v1 }
 0x478   :  { %v692_v54 = vpop.f32.mrb[20].mxu1 }
 0x479   :  { %v2417_v55 = vpop.f32.mrb[21].mxu1 }
 0x47a   :  { %v695_v56 = vpop.f32.mrb[22].mxu1 }
 0x47b   :  { %v2418_v19 = vpop.f32.mrb[23].mxu1 }
 0x47d   :  { %v740_v57 = vpop.f32.mrb[24].mxu0 }
 0x47e   :  { %v843_v22 = vpack.c.bf16 %v740_v57, %v692_v54  ;;  %v2423_v58 = vpop.f32.mrb[25].mxu0 }
 0x47f   :  { %v743_v59 = vpop.f32.mrb[26].mxu0 }
 0x480   :  { %v2424_v17 = vpop.f32.mrb[27].mxu0  ;;  %2446 = vmatmul.mubr.msk.bf16.gmra.mrb[32].mxu1 %vm71_vm1, %v843_v22  ;;  %v788_v60 = vpop.f32.mrb[24].mxu1 }
 0x481   :  { %v2429_v61 = vpop.f32.mrb[25].mxu1  ;;  %2449 = vmatprep.mubr.msk.bf16.mxu1 %vm2717_vm0, %v2716_v1 }
 0x482   :  { %v791_v62 = vpop.f32.mrb[26].mxu1 }
 0x483   :  { %v2430_v63 = vpop.f32.mrb[27].mxu1 }
 0x485   :  { %v836_v5 = vpop.f32.mrb[28].mxu0 }
 0x486   :  { %v844_v8 = vpack.c.bf16 %v836_v5, %v788_v60  ;;  %v2435_v11 = vpop.f32.mrb[29].mxu0  ;;  %v1003_v5 = vlaneseq }
 0x487   :  { %v839_v12 = vpop.f32.mrb[30].mxu0 }
 0x488   :  { %v2436_v14 = vpop.f32.mrb[31].mxu0  ;;  %2450 = vmatmul.mubr.msk.bf16.gmra.mrb[36].mxu1 %vm71_vm1, %v844_v8 }
 0x489   :  { %2477 = vmatprep.mubr.msk.bf16.mxu1 %vm2717_vm0, %v2716_v1 }
 0x51d   :  { %v894_v15 = vpop.f32.mrb[28].mxu1 }
 0x51e   :  { %v918_v28 = vadd.f32 %v894_v15, %v2811_v3  ;;  %v2443_v25 = vpop.f32.mrb[29].mxu1  ;;  %v3035_v15 = vshrl.u32 %v1003_v5, 7 }
 0x51f   :  { %v897_v0 = vpop.f32.mrb[30].mxu1  ;;  %v3041_v25 = vld [vmem:[%s3322_s4] sm:$0xff] }
 0x520   :  { %v919_v2 = vadd.f32 %v897_v0, %v2816_v4  ;;  %v2444_v16 = vpop.f32.mrb[31].mxu1  ;;  %v924_v18 = vsel %vm71_vm1, %v918_v28, 0.0 }
 0x521   :  { %925 = vadd.xlane.f32.xlu0 %v924_v18 }
 0x522   :  { %v927_v20 = vsel %vm71_vm1, %v919_v2, 0.0 }
 0x523   :  { %928 = vadd.xlane.f32.xlu1 %v927_v20 }
 0x553   :  { %v902_v21 = vpop.f32.mrb[32].mxu1 }
 0x554   :  { %v920_v23 = vadd.f32 %v902_v21, %v2831_v6  ;;  %v2447_v24 = vpop.f32.mrb[33].mxu1 }
 0x555   :  { %v905_v26 = vpop.f32.mrb[34].mxu1 }
 0x556   :  { %v921_v27 = vadd.f32 %v905_v26, %v2836_v7  ;;  %v2448_v29 = vpop.f32.mrb[35].mxu1  ;;  %v930_v3 = vsel %vm71_vm1, %v920_v23, 0.0 }
 0x557   :  { %931 = vadd.xlane.f32.xlu0 %v930_v3 }
 0x558   :  { %v933_v4 = vsel %vm71_vm1, %v921_v27, 0.0 }
 0x55b   :  { %934 = vadd.xlane.f32.xlu0 %v933_v4  ;;  %v910_v30 = vpop.f32.mrb[36].mxu1 }
 0x55c   :  { %v922_v31 = vadd.f32 %v910_v30, %v2846_v9  ;;  %v2451_v32 = vpop.f32.mrb[37].mxu1 }
 0x55d   :  { %v913_v33 = vpop.f32.mrb[38].mxu1 }
 0x55e   :  { %v923_v34 = vadd.f32 %v913_v33, %v2851_v10  ;;  %v2452_v35 = vpop.f32.mrb[39].mxu1  ;;  %v936_v6 = vsel %vm71_vm1, %v922_v31, 0.0 }
 0x55f   :  { %937 = vadd.xlane.f32.xlu1 %v936_v6 }
 0x560   :  { %v939_v7 = vsel %vm71_vm1, %v923_v34, 0.0 }
 0x561   :  { %940 = vadd.xlane.f32.xlu0 %v939_v7 }
 0x5ae   :  { %v926_v36 = vpop.xlane.xlu0 %925 }
 0x5af   :  { %v943_v37 = vmul.f32 0.03125, %v926_v36 }
 0x5b0   :  { %v929_v38 = vpop.xlane.xlu1 %928 }
 0x5b1   :  { %v949_v39 = vsub.f32 %v918_v28, %v943_v37  ;;  %v944_v40 = vmul.f32 0.03125, %v929_v38  ;;  %v1005_v28 = vsub.s32 0, %v3035_v15 }
 0x5b3   :  { %v950_v41 = vsub.f32 %v919_v2, %v944_v40  ;;  %v955_v42 = vmul.f32 %v949_v39, %v949_v39  ;;  %v1006_v0 = vrot.slane %v3041_v25, %v1005_v28  ;;  %v1015_v2 = vsub.s32 1, %v3035_v15 }
 0x5b5   :  { %v961_v9 = vsel %vm71_vm1, %v955_v42, 0.0  ;;  %v956_v43 = vmul.f32 %v950_v41, %v950_v41  ;;  %v1016_v24 = vrot.slane %v3041_v25, %v1015_v2 }
 0x5b6   :  { %962 = vadd.xlane.f32.xlu1 %v961_v9 }
 0x5b7   :  { %v964_v10 = vsel %vm71_vm1, %v956_v43, 0.0 }
 0x5b8   :  { %965 = vadd.xlane.f32.xlu0 %v964_v10 }
 0x5e4   :  { %v932_v47 = vpop.xlane.xlu0 %931 }
 0x5e5   :  { %v945_v13 = vmul.f32 0.03125, %v932_v47 }
 0x5e7   :  { %v3023_v44 = vsub.f32 %v920_v23, %v945_v13 }
 0x5e8   :  { %v935_v48 = vpop.xlane.xlu0 %934 }
 0x5e9   :  { %v946_v49 = vmul.f32 0.03125, %v935_v48  ;;  %v957_v50 = vmul.f32 %v3023_v44, %v3023_v44 }
 0x5eb   :  { %v3027_v51 = vsub.f32 %v921_v27, %v946_v49  ;;  %v967_v52 = vsel %vm71_vm1, %v957_v50, 0.0 }
 0x5ec   :  { %968 = vadd.xlane.f32.xlu1 %v967_v52  ;;  %v938_v53 = vpop.xlane.xlu1 %937 }
 0x5ed   :  { %v947_v54 = vmul.f32 0.03125, %v938_v53  ;;  %v958_v55 = vmul.f32 %v3027_v51, %v3027_v51 }
 0x5ee   :  { %v941_v56 = vpop.xlane.xlu0 %940 }
 0x5ef   :  { %v953_v19 = vsub.f32 %v922_v31, %v947_v54  ;;  %v948_v57 = vmul.f32 0.03125, %v941_v56  ;;  %v970_v22 = vsel %vm71_vm1, %v958_v55, 0.0  ;;  %v2620_v54 = vld [vmem:[%s3325_s7] sm:$0xff]   ;;  %v2621_v55 = vld [vmem:[%s3325_s7 + $0x8] sm:$0xff]   ;;  %v2622_v56 = vld [vmem:[%s3325_s7 + $0x10] sm:$0xff]  }
 0x5f0   :  { %971 = vadd.xlane.f32.xlu0 %v970_v22  ;;  %2470 = vmatpush3.bf16.msra.mxu1 %v2620_v54 }
 0x5f1   :  { %v954_v58 = vsub.f32 %v923_v34, %v948_v57  ;;  %v959_v59 = vmul.f32 %v953_v19, %v953_v19  ;;  %2471 = vmatprep.subr.bf16.mxu1 %v2716_v1  ;;  %v2238_v57 = vld [vmem:[%s3324_s6] ss:$0 sm:$0xff] }
 0x5f3   :  { %v973_v17 = vsel %vm71_vm1, %v959_v59, 0.0  ;;  %v960_v60 = vmul.f32 %v954_v58, %v954_v58 }
 0x5f4   :  { %974 = vadd.xlane.f32.xlu1 %v973_v17  ;;  %2472 = vmatpush3.bf16.msra.mxu1 %v2621_v55 }
 0x5f5   :  { %v976_v61 = vsel %vm71_vm1, %v960_v60, 0.0  ;;  %2473 = vmatprep.subr.bf16.mxu1 %v2716_v1 }
 0x5f6   :  { %977 = vadd.xlane.f32.xlu0 %v976_v61 }
 0x5f8   :  { %2474 = vmatpush3.bf16.msra.mxu1 %v2622_v56 }
 0x5f9   :  { %2475 = vmatprep.subr.bf16.mxu1 %v2716_v1 }
 0x643   :  { %v963_v62 = vpop.xlane.xlu1 %962 }
 0x644   :  { %v979_v63 = vmul.f32 0.03125, %v963_v62 }
 0x645   :  { %v966_v8 = vpop.xlane.xlu0 %965 }
 0x646   :  { %v985_v11 = vadd.f32 1e-12, %v979_v63  ;;  %v980_v12 = vmul.f32 0.03125, %v966_v8 }
 0x648   :  { %2650 = vrsqrt.f32 %v985_v11  ;;  %v986_v14 = vadd.f32 1e-12, %v980_v12 }
 0x64a   :  { %2652 = vrsqrt.f32 %v986_v14 }
 0x652   :  { %v2651_v16 = vpop.eup %2650 }
 0x653   :  { %v997_v18 = vmul.f32 %v2651_v16, %v949_v39 }
 0x654   :  { %v2653_v20 = vpop.eup %2652 }
 0x655   :  { %v1007_v21 = vmul.f32 %v1006_v0, %v997_v18  ;;  %v998_v23 = vmul.f32 %v2653_v20, %v950_v41 }
 0x657   :  { %v1008_v26 = vmul.f32 %v1006_v0, %v998_v23  ;;  %v3046_v27 = vadd.f32 %v1016_v24, %v1007_v21 }
 0x659   :  { %v3048_v29 = vadd.f32 %v1016_v24, %v1008_v26 }
 0x65b   :  { %v1023_v3 = vpack.c.bf16 %v3048_v29, %v3046_v27 }
 0x65d   :  { %2458 = vmatmul.mubr.msk.bf16.vlgmr.msra.gmra.mrb[32].mxu0 %vm71_vm1, %v1023_v3 }
 0x65e   :  { %2461 = vmatprep.mubr.msk.bf16.mxu0 %vm2717_vm0, %v2716_v1 }
 0x679   :  { %v969_v4 = vpop.xlane.xlu1 %968 }
 0x67a   :  { %v981_v30 = vmul.f32 0.03125, %v969_v4 }
 0x67c   :  { %v987_v31 = vadd.f32 1e-12, %v981_v30 }
 0x67d   :  { %v972_v32 = vpop.xlane.xlu0 %971 }
 0x67e   :  { %2654 = vrsqrt.f32 %v987_v31  ;;  %v982_v33 = vmul.f32 0.03125, %v972_v32 }
 0x680   :  { %v988_v34 = vadd.f32 1e-12, %v982_v33 }
 0x681   :  { %v975_v35 = vpop.xlane.xlu1 %974 }
 0x682   :  { %2656 = vrsqrt.f32 %v988_v34  ;;  %v983_v6 = vmul.f32 0.03125, %v975_v35 }
 0x683   :  { %v978_v7 = vpop.xlane.xlu0 %977 }
 0x684   :  { %v989_v36 = vadd.f32 1e-12, %v983_v6  ;;  %v984_v37 = vmul.f32 0.03125, %v978_v7 }
 0x686   :  { %2658 = vrsqrt.f32 %v989_v36  ;;  %v990_v38 = vadd.f32 1e-12, %v984_v37 }
 0x688   :  { %v2655_v39 = vpop.eup %2654  ;;  %2660 = vrsqrt.f32 %v990_v38 }
 0x689   :  { %v999_v40 = vmul.f32 %v2655_v39, %v3023_v44 }
 0x68b   :  { %v1009_v9 = vmul.f32 %v1006_v0, %v999_v40 }
 0x68c   :  { %v2657_v41 = vpop.eup %2656 }
 0x68d   :  { %v1000_v42 = vmul.f32 %v2657_v41, %v3027_v51  ;;  %v3057_v46 = vadd.f32 %v1016_v24, %v1009_v9 }
 0x68f   :  { %v1010_v43 = vmul.f32 %v1006_v0, %v1000_v42 }
 0x690   :  { %v2659_v10 = vpop.eup %2658 }
 0x691   :  { %v1001_v45 = vmul.f32 %v2659_v10, %v953_v19  ;;  %v3059_v47 = vadd.f32 %v1016_v24, %v1010_v43  ;;  %v2623_v19 = vld [vmem:[%s3325_s7 + $0x18] sm:$0xff]  }
 0x692   :  { %v2661_v13 = vpop.eup %2660  ;;  %2476 = vmatpush3.bf16.msra.mxu1 %v2623_v19 }
 0x693   :  { %v1002_v48 = vmul.f32 %v2661_v13, %v954_v58  ;;  %v1024_v49 = vpack.c.bf16 %v3059_v47, %v3057_v46  ;;  %v1011_v50 = vmul.f32 %v1006_v0, %v1001_v45  ;;  %2509 = vmatprep.subr.bf16.mxu1 %v2716_v1 }
 0x695   :  { %2462 = vmatmul.mubr.msk.bf16.gmra.mrb[36].mxu0 %vm71_vm1, %v1024_v49  ;;  %v1012_v44 = vmul.f32 %v1006_v0, %v1002_v48  ;;  %v3064_v52 = vadd.f32 %v1016_v24, %v1011_v50 }
 0x696   :  { %2465 = vmatprep.mubr.msk.bf16.mxu0 %vm2717_vm0, %v2716_v1 }
 0x697   :  { %v3068_v51 = vadd.f32 %v1016_v24, %v1012_v44 }
 0x699   :  { %v1025_v53 = vpack.c.bf16 %v3068_v51, %v3064_v52 }
 0x69d   :  { %2466 = vmatmul.mubr.msk.bf16.gmra.mrb[40].mxu0 %vm71_vm1, %v1025_v53 }
 0x69e   :  { %2491 = vmatprep.mubr.msk.f32.mxu0 %vm2717_vm0, %v2716_v1 }
 0x730   :  { %v1092_v22 = vpop.f32.mrb[32].mxu0 }
 0x731   :  { %v1093_v58 = vadd.f32 %v2238_v57, %v1092_v22  ;;  %v2459_v59 = vpop.f32.mrb[33].mxu0 }
 0x732   :  { %v1095_v17 = vpop.f32.mrb[34].mxu0 }
 0x733   :  { %v1115_v60 = vmul.f32 %v1093_v58, %v1093_v58  ;;  %v1096_v61 = vadd.f32 %v2238_v57, %v1095_v17  ;;  %v2460_v62 = vpop.f32.mrb[35].mxu0 }
 0x735   :  { %v1121_v63 = vmul.f32 %v1115_v60, %v1093_v58  ;;  %v1116_v5 = vmul.f32 %v1096_v61, %v1096_v61 }
 0x737   :  { %v1127_v8 = vmul.f32 0.044715, %v1121_v63  ;;  %v1122_v11 = vmul.f32 %v1116_v5, %v1096_v61 }
 0x739   :  { %v1133_v12 = vadd.f32 %v1127_v8, %v1093_v58  ;;  %v1128_v14 = vmul.f32 0.044715, %v1122_v11 }
 0x73b   :  { %v1139_v28 = vmul.f32 0.7978846, %v1133_v12  ;;  %v1134_v0 = vadd.f32 %v1128_v14, %v1096_v61 }
 0x73d   :  { %2662 = vtanh.f32 %v1139_v28  ;;  %v1140_v2 = vmul.f32 0.7978846, %v1134_v0 }
 0x73f   :  { %2664 = vtanh.f32 %v1140_v2 }
 0x747   :  { %v2663_v16 = vpop.eup %2662 }
 0x748   :  { %v1151_v18 = vadd.f32 1.0, %v2663_v16 }
 0x749   :  { %v2665_v20 = vpop.eup %2664 }
 0x74a   :  { %v1157_v21 = vmul.f32 0.5, %v1151_v18  ;;  %v1152_v23 = vadd.f32 1.0, %v2665_v20 }
 0x74c   :  { %v1158_v24 = vmul.f32 0.5, %v1152_v23  ;;  %v1163_v26 = vmul.f32 %v1157_v21, %v1093_v58  ;;  %v1182_v23 = vsub.s32 4, %v3035_v15 }
 0x74e   :  { %v1164_v3 = vmul.f32 %v1158_v24, %v1096_v61  ;;  %v1183_v24 = vrot.slane %v3041_v25, %v1182_v23 }
 0x750   :  { %v1169_v4 = vpack.c.bf16 %v1164_v3, %v1163_v26 }
 0x752   :  { %2478 = vmatmul.mubr.msk.bf16.vlgmr.msra.gmra.mrb[40].mxu1 %vm1208_vm4, %v1169_v4 }
 0x753   :  { %2481 = vmatprep.mubr.msk.bf16.mxu1 %vm2717_vm0, %v2716_v1 }
 0x768   :  { %v1100_v30 = vpop.f32.mrb[36].mxu0 }
 0x769   :  { %v1101_v31 = vadd.f32 %v2238_v57, %v1100_v30  ;;  %v2463_v32 = vpop.f32.mrb[37].mxu0 }
 0x76a   :  { %v1103_v33 = vpop.f32.mrb[38].mxu0 }
 0x76b   :  { %v1117_v34 = vmul.f32 %v1101_v31, %v1101_v31  ;;  %v1104_v35 = vadd.f32 %v2238_v57, %v1103_v33  ;;  %v2464_v6 = vpop.f32.mrb[39].mxu0 }
 0x76d   :  { %v1123_v7 = vmul.f32 %v1117_v34, %v1101_v31  ;;  %v1118_v36 = vmul.f32 %v1104_v35, %v1104_v35 }
 0x76f   :  { %v1129_v37 = vmul.f32 0.044715, %v1123_v7  ;;  %v1124_v38 = vmul.f32 %v1118_v36, %v1104_v35 }
 0x770   :  { %v1108_v39 = vpop.f32.mrb[40].mxu0 }
 0x771   :  { %v1135_v40 = vadd.f32 %v1129_v37, %v1101_v31  ;;  %v1130_v41 = vmul.f32 0.044715, %v1124_v38  ;;  %v1109_v42 = vadd.f32 %v2238_v57, %v1108_v39  ;;  %v2467_v9 = vpop.f32.mrb[41].mxu0 }
 0x772   :  { %v1111_v43 = vpop.f32.mrb[42].mxu0 }
 0x773   :  { %v1141_v10 = vmul.f32 0.7978846, %v1135_v40  ;;  %v1136_v45 = vadd.f32 %v1130_v41, %v1104_v35  ;;  %v1119_v13 = vmul.f32 %v1109_v42, %v1109_v42  ;;  %v1112_v48 = vadd.f32 %v2238_v57, %v1111_v43  ;;  %v2468_v49 = vpop.f32.mrb[43].mxu0 }
 0x775   :  { %2666 = vtanh.f32 %v1141_v10  ;;  %v1142_v50 = vmul.f32 0.7978846, %v1136_v45  ;;  %v1125_v44 = vmul.f32 %v1119_v13, %v1109_v42  ;;  %v1120_v53 = vmul.f32 %v1112_v48, %v1112_v48 }
 0x777   :  { %2668 = vtanh.f32 %v1142_v50  ;;  %v1131_v54 = vmul.f32 0.044715, %v1125_v44  ;;  %v1126_v55 = vmul.f32 %v1120_v53, %v1112_v48 }
 0x779   :  { %v1137_v56 = vadd.f32 %v1131_v54, %v1109_v42  ;;  %v1132_v19 = vmul.f32 0.044715, %v1126_v55 }
 0x77b   :  { %v1143_v22 = vmul.f32 0.7978846, %v1137_v56  ;;  %v1138_v58 = vadd.f32 %v1132_v19, %v1112_v48 }
 0x77d   :  { %2670 = vtanh.f32 %v1143_v22  ;;  %v1144_v59 = vmul.f32 0.7978846, %v1138_v58 }
 0x77f   :  { %v2667_v17 = vpop.eup %2666  ;;  %2672 = vtanh.f32 %v1144_v59 }
 0x780   :  { %v1153_v60 = vadd.f32 1.0, %v2667_v17 }
 0x781   :  { %v2669_v61 = vpop.eup %2668 }
 0x782   :  { %v1159_v62 = vmul.f32 0.5, %v1153_v60  ;;  %v1154_v57 = vadd.f32 1.0, %v2669_v61 }
 0x784   :  { %v1160_v63 = vmul.f32 0.5, %v1154_v57  ;;  %v1165_v5 = vmul.f32 %v1159_v62, %v1101_v31 }
 0x786   :  { %v1166_v8 = vmul.f32 %v1160_v63, %v1104_v35 }
 0x787   :  { %v2671_v11 = vpop.eup %2670 }
 0x788   :  { %v1155_v12 = vadd.f32 1.0, %v2671_v11  ;;  %v1170_v14 = vpack.c.bf16 %v1166_v8, %v1165_v5 }
 0x789   :  { %v2673_v28 = vpop.eup %2672 }
 0x78a   :  { %v1161_v0 = vmul.f32 0.5, %v1155_v12  ;;  %v1156_v2 = vadd.f32 1.0, %v2673_v28  ;;  %2482 = vmatmul.mubr.msk.bf16.gmra.mrb[44].mxu1 %vm1208_vm4, %v1170_v14 }
 0x78b   :  { %2485 = vmatprep.mubr.msk.bf16.mxu1 %vm2717_vm0, %v2716_v1 }
 0x78c   :  { %v1162_v16 = vmul.f32 0.5, %v1156_v2  ;;  %v1167_v18 = vmul.f32 %v1161_v0, %v1109_v42 }
 0x78e   :  { %v1168_v20 = vmul.f32 %v1162_v16, %v1112_v48 }
 0x790   :  { %v1171_v21 = vpack.c.bf16 %v1168_v20, %v1167_v18 }
 0x792   :  { %2486 = vmatmul.mubr.msk.bf16.gmra.mrb[48].mxu1 %vm1208_vm4, %v1171_v21 }
 0x793   :  { %2513 = vmatprep.mubr.msk.bf16.mxu1 %vm2717_vm0, %v2716_v1 }
 0x825   :  { %v1252_v26 = vpop.f32.mrb[40].mxu1 }
 0x826   :  { %v1253_v3 = vadd.f32 %v1252_v26, %v1183_v24  ;;  %v2479_v4 = vpop.f32.mrb[41].mxu1  ;;  %v2625_v26 = vld [vmem:[%s3326_s8 + $0x8] sm:$0xff]  }
 0x827   :  { %v1255_v30 = vpop.f32.mrb[42].mxu1 }
 0x828   :  { %v1256_v31 = vadd.f32 %v1255_v30, %v1183_v24  ;;  %v2480_v32 = vpop.f32.mrb[43].mxu1  ;;  %v1275_v33 = vadd.f32 %v1253_v3, %v3046_v27  ;;  %v2721_v3 = vmov 0.0|0.0  }
 0x82a   :  { %v1281_v34 = vsel %vm71_vm1, %v1275_v33, 0.0  ;;  %v1276_v35 = vadd.f32 %v1256_v31, %v3048_v29 }
 0x82b   :  { %1282 = vadd.xlane.f32.xlu1 %v1281_v34 }
 0x82c   :  { %v1284_v6 = vsel %vm71_vm1, %v1276_v35, 0.0 }
 0x82f   :  { %1285 = vadd.xlane.f32.xlu1 %v1284_v6  ;;  %v1371_v6 = vsub.s32 3, %v3035_v15 }
 0x85d   :  { %v1260_v7 = vpop.f32.mrb[44].mxu1 }
 0x85e   :  { %v1261_v36 = vadd.f32 %v1260_v7, %v1183_v24  ;;  %v2483_v37 = vpop.f32.mrb[45].mxu1 }
 0x85f   :  { %v1263_v38 = vpop.f32.mrb[46].mxu1 }
 0x860   :  { %v1264_v39 = vadd.f32 %v1263_v38, %v1183_v24  ;;  %v2484_v40 = vpop.f32.mrb[47].mxu1  ;;  %v1277_v41 = vadd.f32 %v1261_v36, %v3057_v46  ;;  %v3153_v38 = vrot.slane %v3041_v25, %v1371_v6 }
 0x862   :  { %v1287_v42 = vsel %vm71_vm1, %v1277_v41, 0.0  ;;  %v1278_v27 = vadd.f32 %v1264_v39, %v3059_v47 }
 0x863   :  { %1288 = vadd.xlane.f32.xlu0 %v1287_v42  ;;  %v1379_v42 = vld [vmem:[%s3320_s2] sm:$0x1] }
 0x864   :  { %v1290_v10 = vsel %vm71_vm1, %v1278_v27, 0.0 }
 0x865   :  { %v1268_v9 = vpop.f32.mrb[48].mxu1 }
 0x866   :  { %v1269_v43 = vadd.f32 %v1268_v9, %v1183_v24  ;;  %v2487_v29 = vpop.f32.mrb[49].mxu1 }
 0x867   :  { %1291 = vadd.xlane.f32.xlu0 %v1290_v10  ;;  %v1271_v45 = vpop.f32.mrb[50].mxu1  ;;  %v1380_v29 = vld [vmem:[%s3320_s2 + $0x1] sm:$0x1] }
 0x868   :  { %v1272_v13 = vadd.f32 %v1271_v45, %v1183_v24  ;;  %v2488_v48 = vpop.f32.mrb[51].mxu1  ;;  %v1279_v49 = vadd.f32 %v1269_v43, %v3064_v52  ;;  %v2624_v24 = vld [vmem:[%s3326_s8] sm:$0xff]  }
 0x869   :  { %2510 = vmatpush3.bf16.msra.mxu1 %v2624_v24 }
 0x86a   :  { %v1293_v50 = vsel %vm71_vm1, %v1279_v49, 0.0  ;;  %v1280_v46 = vadd.f32 %v1272_v13, %v3068_v51  ;;  %2511 = vmatprep.subr.bf16.mxu1 %v2716_v1 }
 0x86b   :  { %1294 = vadd.xlane.f32.xlu1 %v1293_v50 }
 0x86c   :  { %v1296_v44 = vsel %vm71_vm1, %v1280_v46, 0.0 }
 0x86d   :  { %1297 = vadd.xlane.f32.xlu0 %v1296_v44  ;;  %2512 = vmatpush3.bf16.msra.mxu1 %v2625_v26 }
 0x86e   :  { %2582 = vmatprep.subr.bf16.mxu1 %v2721_v3 }
 0x8b8   :  { %v1283_v47 = vpop.xlane.xlu1 %1282 }
 0x8b9   :  { %v1299_v53 = vmul.f32 0.03125, %v1283_v47 }
 0x8bb   :  { %v1305_v54 = vsub.f32 %v1275_v33, %v1299_v53 }
 0x8bc   :  { %v1286_v55 = vpop.xlane.xlu1 %1285 }
 0x8bd   :  { %v1300_v56 = vmul.f32 0.03125, %v1286_v55  ;;  %v1311_v19 = vmul.f32 %v1305_v54, %v1305_v54 }
 0x8bf   :  { %v1306_v22 = vsub.f32 %v1276_v35, %v1300_v56  ;;  %v1317_v58 = vsel %vm71_vm1, %v1311_v19, 0.0  ;;  %v1361_v35 = vsub.s32 2, %v3035_v15 }
 0x8c0   :  { %1318 = vadd.xlane.f32.xlu1 %v1317_v58 }
 0x8c1   :  { %v1312_v59 = vmul.f32 %v1306_v22, %v1306_v22  ;;  %v3150_v7 = vrot.slane %v3041_v25, %v1361_v35 }
 0x8c3   :  { %v1320_v52 = vsel %vm71_vm1, %v1312_v59, 0.0 }
 0x8c4   :  { %1321 = vadd.xlane.f32.xlu1 %v1320_v52  ;;  %v1381_v52 = vld [vmem:[%s3320_s2 + $0x2] sm:$0x1] }
 0x8f0   :  { %v1289_v17 = vpop.xlane.xlu0 %1288 }
 0x8f1   :  { %v1301_v51 = vmul.f32 0.03125, %v1289_v17 }
 0x8f3   :  { %v3119_v60 = vsub.f32 %v1277_v41, %v1301_v51 }
 0x8f4   :  { %v1292_v61 = vpop.xlane.xlu0 %1291 }
 0x8f5   :  { %v1302_v62 = vmul.f32 0.03125, %v1292_v61  ;;  %v1313_v57 = vmul.f32 %v3119_v60, %v3119_v60  ;;  %v1777_v61 = vld [vmem:[%s3327_s9 + $0x20] sm:$0xff] }
 0x8f7   :  { %v3123_v63 = vsub.f32 %v1278_v27, %v1302_v62  ;;  %v1323_v5 = vsel %vm71_vm1, %v1313_v57, 0.0 }
 0x8f8   :  { %v1295_v8 = vpop.xlane.xlu1 %1294  ;;  %1324 = vadd.xlane.f32.xlu0 %v1323_v5 }
 0x8f9   :  { %v1303_v11 = vmul.f32 0.03125, %v1295_v8  ;;  %v1314_v12 = vmul.f32 %v3123_v63, %v3123_v63 }
 0x8fa   :  { %v1298_v14 = vpop.xlane.xlu0 %1297 }
 0x8fb   :  { %v3128_v28 = vsub.f32 %v1279_v49, %v1303_v11  ;;  %v1304_v0 = vmul.f32 0.03125, %v1298_v14  ;;  %v1326_v2 = vsel %vm71_vm1, %v1314_v12, 0.0  ;;  %v1382_v11 = vld [vmem:[%s3320_s2 + $0x3] sm:$0x1] }
 0x8fc   :  { %1327 = vadd.xlane.f32.xlu0 %v1326_v2 }
 0x8fd   :  { %v3131_v16 = vsub.f32 %v1280_v46, %v1304_v0  ;;  %v1315_v18 = vmul.f32 %v3128_v28, %v3128_v28 }
 0x8ff   :  { %v1329_v20 = vsel %vm71_vm1, %v1315_v18, 0.0  ;;  %v1316_v21 = vmul.f32 %v3131_v16, %v3131_v16 }
 0x900   :  { %1330 = vadd.xlane.f32.xlu1 %v1329_v20 }
 0x901   :  { %v1332_v23 = vsel %vm71_vm1, %v1316_v21, 0.0 }
 0x902   :  { %1333 = vadd.xlane.f32.xlu0 %v1332_v23 }
 0x94d   :  { %v1319_v4 = vpop.xlane.xlu1 %1318 }
 0x94e   :  { %v1335_v30 = vmul.f32 0.03125, %v1319_v4 }
 0x950   :  { %v1341_v31 = vadd.f32 1e-12, %v1335_v30 }
 0x951   :  { %v1322_v32 = vpop.xlane.xlu1 %1321 }
 0x952   :  { %2674 = vrsqrt.f32 %v1341_v31  ;;  %v1336_v33 = vmul.f32 0.03125, %v1322_v32 }
 0x954   :  { %v1342_v34 = vadd.f32 1e-12, %v1336_v33 }
 0x956   :  { %2676 = vrsqrt.f32 %v1342_v34 }
 0x95c   :  { %v2675_v36 = vpop.eup %2674 }
 0x95d   :  { %v1353_v37 = vmul.f32 %v2675_v36, %v1305_v54 }
 0x95f   :  { %v1363_v39 = vmul.f32 %v3150_v7, %v1353_v37 }
 0x960   :  { %v2677_v40 = vpop.eup %2676 }
 0x961   :  { %v3157_v41 = vadd.f32 %v3153_v38, %v1363_v39  ;;  %v1354_v27 = vmul.f32 %v2677_v40, %v1306_v22 }
 0x963   :  { %2490 = vmatpush3.msra.mxu0 %v3157_v41  ;;  %v1364_v9 = vmul.f32 %v3150_v7, %v1354_v27 }
 0x964   :  { %2494 = vmatprep.subr.mxu0 %v2716_v1  ;;  %2492 = vmatmul.mubr.msk.f32.vlgmr.msra.gmra.mrb[44].mxu0 %vm480_vm2, %v1379_v42 }
 0x965   :  { %v1374_v43 = vadd.f32 %v3153_v38, %v1364_v9  ;;  %2496 = vmatprep.mubr.msk.f32.mxu0 %vm2717_vm0, %v2716_v1  ;;  %v1780_v9 = vld [vmem:[%s3327_s9 + $0x38] sm:$0xff] }
 0x967   :  { %2495 = vmatpush3.msra.mxu0 %v1374_v43  ;;  %v1676_v51 = vpack.c.bf16 %v1374_v43, %v1374_v43 }
 0x968   :  { %2499 = vmatprep.subr.mxu0 %v2716_v1  ;;  %2497 = vmatmul.mubr.msk.f32.vlgmr.msra.gmra.mrb[46].mxu0 %vm480_vm2, %v1380_v29  ;;  %v1773_v29 = vld [vmem:[%s3327_s9] sm:$0xff] }
 0x969   :  { %2501 = vmatprep.mubr.msk.f32.mxu0 %vm2717_vm0, %v2716_v1  ;;  %v1696_v0 = vunpack.c.l.b16 %v1676_v51 }
 0x985   :  { %v1325_v10 = vpop.xlane.xlu0 %1324 }
 0x986   :  { %v1337_v45 = vmul.f32 0.03125, %v1325_v10  ;;  %v1774_v10 = vld [vmem:[%s3327_s9 + $0x8] sm:$0xff] }
 0x988   :  { %v1343_v13 = vadd.f32 1e-12, %v1337_v45  ;;  %v2583_v45 = vpack.c.bf16 %v1774_v10, %v1773_v29 }
 0x989   :  { %v1328_v48 = vpop.xlane.xlu0 %1327 }
 0x98a   :  { %2678 = vrsqrt.f32 %v1343_v13  ;;  %v1338_v49 = vmul.f32 0.03125, %v1328_v48  ;;  %v1775_v13 = vld [vmem:[%s3327_s9 + $0x10] sm:$0xff]  ;;  %v1776_v48 = vld [vmem:[%s3327_s9 + $0x18] sm:$0xff] }
 0x98c   :  { %v1344_v50 = vadd.f32 1e-12, %v1338_v49  ;;  %v2586_v49 = vpack.c.bf16 %v1776_v48, %v1775_v13 }
 0x98d   :  { %v1331_v46 = vpop.xlane.xlu1 %1330 }
 0x98e   :  { %2680 = vrsqrt.f32 %v1344_v50  ;;  %v1339_v44 = vmul.f32 0.03125, %v1331_v46 }
 0x98f   :  { %v1334_v47 = vpop.xlane.xlu0 %1333 }
 0x990   :  { %v1345_v53 = vadd.f32 1e-12, %v1339_v44  ;;  %v1340_v54 = vmul.f32 0.03125, %v1334_v47  ;;  %v1781_v44 = vld [vmem:[%s3327_s9 + $0x40] sm:$0xff]  ;;  %v1782_v47 = vld [vmem:[%s3327_s9 + $0x48] sm:$0xff] }
 0x992   :  { %2682 = vrsqrt.f32 %v1345_v53  ;;  %v1346_v55 = vadd.f32 1e-12, %v1340_v54 }
 0x994   :  { %v2679_v56 = vpop.eup %2678  ;;  %2684 = vrsqrt.f32 %v1346_v55 }
 0x995   :  { %v1355_v19 = vmul.f32 %v2679_v56, %v3119_v60  ;;  %v1778_v60 = vld [vmem:[%s3327_s9 + $0x28] sm:$0xff]  ;;  %v2589_v56 = vpack.c.bf16 %v1782_v47, %v1781_v44 }
 0x996   :  { %v2577_v12 = vpack.c.bf16 %v1778_v60, %v1777_v61 }
 0x997   :  { %v1365_v22 = vmul.f32 %v3150_v7, %v1355_v19  ;;  %v1783_v19 = vld [vmem:[%s3327_s9 + $0x50] sm:$0xff] }
 0x998   :  { %v2681_v58 = vpop.eup %2680 }
 0x999   :  { %v1375_v59 = vadd.f32 %v3153_v38, %v1365_v22  ;;  %v1356_v17 = vmul.f32 %v2681_v58, %v3123_v63  ;;  %v1784_v22 = vld [vmem:[%s3327_s9 + $0x58] sm:$0xff] }
 0x99b   :  { %2500 = vmatpush3.msra.mxu0 %v1375_v59  ;;  %v1677_v62 = vpack.c.bf16 %v1375_v59, %v1375_v59  ;;  %v1366_v57 = vmul.f32 %v3150_v7, %v1356_v17  ;;  %v2592_v59 = vpack.c.bf16 %v1784_v22, %v1783_v19 }
 0x99c   :  { %v2683_v5 = vpop.eup %2682  ;;  %2504 = vmatprep.subr.mxu0 %v2716_v1  ;;  %2502 = vmatmul.mubr.msk.f32.vlgmr.msra.gmra.mrb[48].mxu0 %vm480_vm2, %v1381_v52 }
 0x99d   :  { %v1357_v63 = vmul.f32 %v2683_v5, %v3128_v28  ;;  %v1376_v8 = vadd.f32 %v3153_v38, %v1366_v57  ;;  %2506 = vmatprep.mubr.msk.f32.mxu0 %vm2717_vm0, %v2716_v1  ;;  %v1697_v20 = vunpack.c.l.b16 %v1677_v62  ;;  %v1675_v28 = vpack.c.bf16 %v3157_v41, %v3157_v41 }
 0x99e   :  { %v2685_v14 = vpop.eup %2684  ;;  %v1687_v57 = vsub.s32 5, %v3035_v15  ;;  %v1787_v15 = vld [vmem:[%s3327_s9 + $0x70] sm:$0xff] }
 0x99f   :  { %v1367_v2 = vmul.f32 %v3150_v7, %v1357_v63  ;;  %v1358_v18 = vmul.f32 %v2685_v14, %v3131_v16  ;;  %2505 = vmatpush3.msra.mxu0 %v1376_v8  ;;  %v1678_v21 = vpack.c.bf16 %v1376_v8, %v1376_v8  ;;  %v1701_v16 = vrot.slane %v1696_v0, 7  ;;  %v1785_v0 = vld [vmem:[%s3327_s9 + $0x60] sm:$0xff] }
 0x9a0   :  { %2507 = vmatmul.mubr.msk.f32.vlgmr.msra.gmra.mrb[50].mxu0 %vm480_vm2, %v1382_v11  ;;  %2576 = vmatprep.subr.bf16.mxu0 %v2721_v3  ;;  %v1704_v31 = vrot.slane %v1697_v20, 6  ;;  %v1695_v32 = vunpack.c.l.b16 %v1675_v28  ;;  %v1688_v5 = vrot.slane %v3041_v25, %v1687_v57  ;;  %v1788_v25 = vld [vmem:[%s3327_s9 + $0x78] sm:$0xff] }
 0x9a1   :  { %v1377_v23 = vadd.f32 %v3153_v38, %v1367_v2  ;;  %v1368_v24 = vmul.f32 %v3150_v7, %v1358_v18  ;;  %v1698_v26 = vunpack.c.l.b16 %v1678_v21  ;;  %2578 = vmatpush3.bf16.msra.mxu0 %v2577_v12  ;;  %2525 = vmatprep.mubr.msk.f32.mxu0 %vm2717_vm0, %v2716_v1  ;;  %v1786_v2 = vld [vmem:[%s3327_s9 + $0x68] sm:$0xff]  ;;  %v2598_v21 = vpack.c.bf16 %v1788_v25, %v1787_v15 }
 0x9a2   :  { %2579 = vmatprep.subr.bf16.mxu0 %v2721_v3  ;;  %v1703_v6 = vsel %vm1702_vm5, %v1701_v16, %v1695_v32  ;;  %v2595_v18 = vpack.c.bf16 %v1786_v2, %v1785_v0  ;;  %v2099_v16 = vld [vmem:[%s3329_s11 + $0x10] sm:$0xff] }
 0x9a3   :  { %v1679_v4 = vpack.c.bf16 %v1377_v23, %v1377_v23  ;;  %v1378_v30 = vadd.f32 %v3153_v38, %v1368_v24  ;;  %v1707_v33 = vrot.slane %v1698_v26, 5  ;;  %v1706_v37 = vsel %vm1705_vm6, %v1704_v31, %v1703_v6  ;;  %v1779_v38 = vld [vmem:[%s3327_s9 + $0x30] sm:$0xff]  ;;  %v2097_v23 = vld [vmem:[%s3329_s11] sm:$0xff]  ;;  %v2098_v24 = vld [vmem:[%s3329_s11 + $0x8] sm:$0xff] }
 0x9a4   :  { %v2580_v43 = vpack.c.bf16 %v1780_v9, %v1779_v38  ;;  %v2601_v26 = vpack.c.bf16 %v2098_v24, %v2097_v23  ;;  %v2102_v31 = vld [vmem:[%s3329_s11 + $0x28] sm:$0xff]  ;;  %v2263_v38 = vld [vmem:[%s3330_s12] ss:$0 sm:$0xff] }
 0x9a5   :  { %v1699_v34 = vunpack.c.l.b16 %v1679_v4  ;;  %v1680_v35 = vpack.c.bf16 %v1378_v30, %v1378_v30  ;;  %v1709_v39 = vsel %vm1708_vm7, %v1707_v33, %v1706_v37  ;;  %v2101_v30 = vld [vmem:[%s3329_s11 + $0x20] sm:$0xff] }
 0x9a6   :  { %2581 = vmatpush3.bf16.msra.mxu0 %v2580_v43  ;;  %v2607_v32 = vpack.c.bf16 %v2102_v31, %v2101_v30 }
 0x9a7   :  { %v1710_v7 = vrot.slane %v1699_v34, 4  ;;  %v1700_v36 = vunpack.c.l.b16 %v1680_v35  ;;  %2588 = vmatprep.subr.bf16.mxu0 %v2721_v3 }
 0x9a9   :  { %v1713_v40 = vrot.slane %v1700_v36, 3  ;;  %v1712_v41 = vsel %vm1711_vm8, %v1710_v7, %v1709_v39 }
 0x9ab   :  { %v1715_v42 = vsel %vm1714_vm9, %v1713_v40, %v1712_v41 }
 0x9ac   :  { %v1716_v27 = vpack.c.b16 %v1715_v42, %v1715_v42 }
 0x9ae   :  { %2514 = vmatmul.mubr.msk.bf16.vlgmr.msra.gmra.mrb[52].mxu1 %vm71_vm1, %v1716_v27 }
 0x9af   :  { %2536 = vmatprep.mubr.msk.f32.mxu1 %vm2717_vm0, %v2716_v1  ;;  %2584 = vmatpush3.bf16.msra.mxu1 %v2583_v45 }
 0x9b0   :  { %2585 = vmatprep.subr.bf16.mxu1 %v2721_v3 }
 0x9b3   :  { %2587 = vmatpush3.bf16.msra.mxu1 %v2586_v49 }
 0x9b4   :  { %2594 = vmatprep.subr.bf16.mxu1 %v2721_v3 }
 0xa37   :  { %v1452_v50 = vpop.f32.mrb[44].mxu0 }
 0xa38   :  { %v2493_v46 = vpop.f32.mrb[45].mxu0 }
 0xa3b   :  { %v1525_v53 = vpop.f32.mrb[46].mxu0 }
 0xa3c   :  { %v1791_v54 = vrot.slane %v1525_v53, 7  ;;  %v2498_v55 = vpop.f32.mrb[47].mxu0 }
 0xa3e   :  { %v1792_v58 = vsel %vm1702_vm5, %v1791_v54, %v1452_v50 }
 0xa3f   :  { %2526 = vmatmul.mubr.msk.f32.vlgmr.msra.gmra.mrb[52].mxu0 %vm71_vm1, %v1792_v58 }
 0xa40   :  { %2590 = vmatpush3.bf16.msra.mxu0 %v2589_v56  ;;  %2547 = vmatprep.mubr.msk.f32.mxu0 %vm2717_vm0, %v2716_v1 }
 0xa41   :  { %2591 = vmatprep.subr.bf16.mxu0 %v2721_v3 }
 0xa44   :  { %2593 = vmatpush3.bf16.msra.mxu0 %v2592_v59 }
 0xa45   :  { %2600 = vmatprep.subr.bf16.mxu0 %v2721_v3 }
 0xa6f   :  { %v1598_v52 = vpop.f32.mrb[48].mxu0 }
 0xa70   :  { %v2503_v17 = vpop.f32.mrb[49].mxu0 }
 0xa73   :  { %v1671_v51 = vpop.f32.mrb[50].mxu0 }
 0xa74   :  { %v1940_v61 = vrot.slane %v1671_v51, 7  ;;  %v2508_v60 = vpop.f32.mrb[51].mxu0 }
 0xa76   :  { %v1941_v62 = vsel %vm1702_vm5, %v1940_v61, %v1598_v52 }
 0xa77   :  { %2548 = vmatmul.mubr.msk.f32.vlgmr.msra.gmra.mrb[54].mxu0 %vm71_vm1, %v1941_v62 }
 0xa78   :  { %2573 = vmatprep.mubr.msk.f32.mxu0 %vm2717_vm0, %v2716_v1  ;;  %2602 = vmatpush3.bf16.msra.mxu0 %v2601_v26 }
 0xa79   :  { %2603 = vmatprep.subr.bf16.mxu0 %v2721_v3 }
 0xa81   :  { %v1766_v63 = vpop.f32.mrb[52].mxu1 }
 0xa82   :  { %v1767_v8 = vadd.f32 %v1766_v63, %v1688_v5  ;;  %v2515_v11 = vpop.f32.mrb[53].mxu1 }
 0xa83   :  { %v1769_v12 = vpop.f32.mrb[54].mxu1 }
 0xa84   :  { %2686 = vtanh.f32 %v1767_v8  ;;  %v2516_v14 = vpop.f32.mrb[55].mxu1 }
 0xa8e   :  { %v2687_v20 = vpop.eup %2686 }
 0xa8f   :  { %2537 = vmatmul.mubr.msk.f32.vlgmr.msra.gmra.mrb[56].mxu1 %vm71_vm1, %v2687_v20  ;;  %v2015_v28 = vrot.slane %v2687_v20, 4 }
 0xa90   :  { %2596 = vmatpush3.bf16.msra.mxu1 %v2595_v18  ;;  %2558 = vmatprep.mubr.msk.f32.mxu1 %vm2717_vm0, %v2716_v1  ;;  %v2100_v1 = vld [vmem:[%s3329_s11 + $0x18] sm:$0xff] }
 0xa91   :  { %2597 = vmatprep.subr.bf16.mxu1 %v2721_v3  ;;  %v2604_v4 = vpack.c.bf16 %v2100_v1, %v2099_v16 }
 0xa93   :  { %2605 = vmatpush3.bf16.msra.mxu0 %v2604_v4 }
 0xa94   :  { %2599 = vmatpush3.bf16.msra.mxu1 %v2598_v21  ;;  %2606 = vmatprep.subr.bf16.mxu0 %v2721_v3  ;;  %v2262_v3 = vld [vmem:[%s3328_s10] ss:$0 sm:$0xff]  ;;  %s2722_s10 = smov [#allocation2]  }
 0xa95   :  { %s2204_s12 = sshll.u32 %s2722_s10, 4  ;;  %s2205_s12 = int_to_ptr.vmem [resolvable:$true] %s2204_s12 }
 0xa96   :  { %s2692_s16 = scalar_lea.vmem %s2205_s12, 32  ;;  %p2697_p1 = scmp.lt.s32.totalorder %s2205_s12, %s2205_s12 }
 0xa97   :  { %2559 = vmatmul.mubr.msk.f32.vlgmr.msra.gmra.mrb[58].mxu1 %vm71_vm1, %v2015_v28  ;;  %2608 = vmatpush3.bf16.msra.mxu0 %v2607_v32  ;;  %p2693_p0 = scmp.ne.s32.totalorder %s2205_s12, %s2692_s16  ;;  %p2698_p2 = scmp.lt.s32.totalorder %s2692_s16, %s2692_s16 }
 0xa99   :  { %p2699_p3 = por %p2698_p2, %p2697_p1 }
 0xa9b   :  { %p2700_p4 = pnand %p2699_p3, %p2693_p0 }
 0xb12   :  { %v1861_v33 = vpop.f32.mrb[52].mxu0 }
 0xb13   :  { %v2527_v34 = vpop.f32.mrb[53].mxu0 }
 0xb4a   :  { %v2010_v35 = vpop.f32.mrb[54].mxu0 }
 0xb4b   :  { %v2549_v6 = vpop.f32.mrb[55].mxu0 }
 0xb62   :  { %v1934_v7 = vpop.f32.mrb[56].mxu1 }
 0xb63   :  { %v1935_v36 = vadd.f32 %v1934_v7, %v1861_v33  ;;  %v2538_v37 = vpop.f32.mrb[57].mxu1 }
 0xb65   :  { %v2014_v39 = vadd.f32 %v2010_v35, %v1935_v36 }
 0xb6a   :  { %v2084_v40 = vpop.f32.mrb[58].mxu1 }
 0xb6b   :  { %v2088_v41 = vadd.f32 %v2084_v40, %v2014_v39  ;;  %v2560_v42 = vpop.f32.mrb[59].mxu1 }
 0xb6d   :  { %v2096_v27 = vadd.f32 %v2262_v3, %v2088_v41 }
 0xb6f   :  { %2574 = vmatmul.mubr.msk.f32.vlgmr.msra.gmra.mrb[56].mxu0 %vm2110_vm10, %v2096_v27 }
 0xc42   :  { %v2180_v9 = vpop.f32.mrb[56].mxu0 }
 0xc43   :  { %v2181_v43 = vadd.f32 %v2263_v38, %v2180_v9  ;;  %v2575_v29 = vpop.f32.mrb[57].mxu0 }
 0xc45   :  { %v2185_v10 = vsel %vm2184_vm11, %v2181_v43, -inf }
 0xc46   :  { %2186 = vmax.xlane.f32.xlu1 %v2185_v10 }
 0xcd3   :  { %v2187_v45 = vpop.xlane.xlu1 %2186 }
 0xcd4   :  { %v2188_v13 = vsub.f32 %v2181_v43, %v2187_v45 }
 0xcd6   :  { %v2189_v48 = vmul.f32 1.442695, %v2188_v13 }
 0xcd8   :  { %2688 = vpow2.f32 %v2189_v48 }
 0xce2   :  { %v2689_v49 = vpop.eup %2688 }
 0xce3   :  { %v2191_v50 = vsel %vm2184_vm11, %v2689_v49, 0.0 }
 0xce4   :  { %2192 = vadd.xlane.f32.xlu0 %v2191_v50 }
 0xd71   :  { %v2193_v46 = vpop.xlane.xlu0 %2192 }
 0xd72   :  { %2690 = vlog2.f32 %v2193_v46 }
 0xd7c   :  { %v2691_v44 = vpop.eup %2690 }
 0xd7d   :  { %v2195_v47 = vmul.f32 0.6931472, %v2691_v44 }
 0xd7f   :  { %v2196_v53 = vsub.f32 %v2188_v13, %v2195_v47 }
 0xd81   :  { %2197 = vst.msk [vmem:[#allocation2] sm:$0x3] %vm2184_vm11, %v2196_v53 }
 0xd82   :  { %2703 = shalt.err (!%p2700_p4)
}
 0xd83   :  { %s2704_s18 = scalar_lea.hbm %s3331_s13, 32 }
 0xd84   :  { %p2705_p5 = scmp.ne.s32.totalorder %s3331_s13, %s2704_s18  ;;  %p2708_p6 = scmp.lt.u32.totalorder %s2704_s18, %s3331_s13 }
 0xd86   :  { %p2710_p7 = pnand %p2708_p6, %p2705_p5 }
 0xd88   :  { %2713 = shalt.err (!%p2710_p7)
}
 0xd89   :  { %2207 = dma.vmem_to_hbm [thread:$0]  %s2205_s12, 32, %s3331_s13, [#allocation3]  }
 0xd8a   :  { %2714 = dma.done.wait [#allocation3], 32  }
 0xd8b   :  { %2715 = vsyncadd [#allocation3], 4294967264 }
 0xd8c   :  { %2211 = vsyncpa [#allocation3], 1 }

</bundles_post_ra>
